<compile_context>
chip_gen: v7x
topology: tpu7x:2x2x1
jax: 0.10.0
libtpu: 0.0.40
codegen_flags: <defaults>
</compile_context>

<pallas_src>
import functools
import math

import jax
import jax.numpy as jnp
from jax.experimental import pallas as pl
from jax.experimental.pallas import tpu as pltpu

_EPS = 1e-5


# ----------------------------- small helpers -------------------------------

def _row_tile(m):
    """Largest row tile that divides m and leaves >= 2 grid steps."""
    for t in (1024, 512, 256, 128, 64, 32, 16, 8):
        if m % t == 0 and m // t >= 2:
            return t
    return m


def _padded_rows_and_tile(m):
    """Row tile for kernels whose zero-padded rows are exact no-ops.

    Prefers big divisor tiles; for large awkward m, pads up to a multiple of
    256 instead of falling back to tiny tiles (per-step overhead dominates
    below ~256 rows)."""
    t = _row_tile(m)
    if m >= 1024 and t < 256:
        return -(-m // 256) * 256, 256
    return m, t


def _mosaic_params():
    return pltpu.CompilerParams(dimension_semantics=("parallel",),
                                vmem_limit_bytes=32 * 1024 * 1024)


def _stats_to_scale_bias(st, count, gamma, beta, eps=_EPS):
    """Fold training-mode BN (batch stats) into per-channel (scale, bias)."""
    c = st.shape[-1]
    st = st.reshape(-1, 8, c)
    total = jnp.sum(st[:, 0, :], axis=0)
    total_sq = jnp.sum(st[:, 1, :], axis=0)
    mean = total / count
    var = jnp.maximum(total_sq / count - mean * mean, 0.0)
    scale = gamma / jnp.sqrt(var + eps)
    bias = beta - mean * scale
    return (scale.reshape(1, -1).astype(jnp.float32),
            bias.reshape(1, -1).astype(jnp.float32))


def _parity_split_flat(x, s):
    """(B, Hp, Wp, C) -> (s*s, B, Hs*Ws, C) so stride-s taps become contiguous."""
    b, hp, wp, c = x.shape
    hp2 = -(-hp // s) * s
    wp2 = -(-wp // s) * s
    x = jnp.pad(x, ((0, 0), (0, hp2 - hp), (0, wp2 - wp), (0, 0)))
    hs, ws = hp2 // s, wp2 // s
    x = x.reshape(b, hs, s, ws, s, c)
    x = jnp.transpose(x, (2, 4, 0, 1, 3, 5))          # (s, s, B, Hs, Ws, C)
    return x.reshape(s * s, b, hs * ws, c)


# ----------------------------- Pallas kernels ------------------------------

def _mm_stats_kernel(a_ref, w_ref, o_ref, st_ref):
    acc = jnp.dot(a_ref[...], w_ref[...], preferred_element_type=jnp.float32)
    o_ref[...] = acc.astype(o_ref.dtype)
    st_ref[0:1, :] = jnp.sum(acc, axis=0, keepdims=True)
    st_ref[1:2, :] = jnp.sum(acc * acc, axis=0, keepdims=True)


def _bnrelu_mm_stats_kernel(a_ref, s_ref, b_ref, w_ref, o_ref, st_ref):
    # Fuses BN+ReLU of the previous stage into this matmul's input tile.
    x = jnp.maximum(a_ref[...].astype(jnp.float32) * s_ref[...] + b_ref[...],
                    0.0)
    acc = jnp.dot(x.astype(jnp.bfloat16), w_ref[...],
                  preferred_element_type=jnp.float32)
    o_ref[...] = acc.astype(o_ref.dtype)
    st_ref[0:1, :] = jnp.sum(acc, axis=0, keepdims=True)
    st_ref[1:2, :] = jnp.sum(acc * acc, axis=0, keepdims=True)


def _conv3x3_kernel(xp_ref, m_ref, s_ref, b_ref, w_ref, o_ref, st_ref,
                    y_scr, acc_scr, *, ho, wo, ws, stride):
    # xp_ref: (s*s, 1, Hs*Ws, Cin) bf16 zero-padded pre-BN activation (1 image)
    # m_ref:  (s*s, 1, Hs*Ws, 1)   f32 halo mask (1 interior, 0 padding)
    # s_/b_ref: (1, Cin)           f32 BN1 scale / bias
    # w_ref:  (9, Cin, Cout)       bf16
    # o_ref:  (1, ho, wo, Cout)    bf16 raw conv2 output
    # st_ref: (8, Cout)            f32 BN2 partials (row0=sum, row1=sumsq)
    # y_scr:  (s*s, Hs*Ws, Cin)    bf16 scratch: BN1+ReLU+mask applied once
    # acc_scr:(q, Cout)            f32 scratch accumulator
    s = stride
    ss = xp_ref.shape[0]
    q = (ho - 1) * ws + wo
    scale = s_ref[...]
    bias = b_ref[...]

    # Pre-activate every input element exactly once (BN1 + ReLU + halo mask).
    for p in range(ss):
        raw = xp_ref[p, 0, :, :].astype(jnp.float32)
        y = jnp.maximum(raw * scale + bias, 0.0) * m_ref[p, 0, :, :]
        y_scr[p, :, :] = y.astype(jnp.bfloat16)

    # Nine shifted-slice matmuls accumulated into a VMEM scratch accumulator.
    for t in range(9):
        dh, dw = t // 3, t % 3
        p = (dh % s) * s + (dw % s)
        off = (dh // s) * ws + (dw // s)
        part = jnp.dot(y_scr[p, pl.ds(off, q), :], w_ref[t, :, :],
                       preferred_element_type=jnp.float32)
        if t == 0:
            acc_scr[...] = part
        else:
            acc_scr[...] += part

    # BN2 partial stats: mask wrap columns once, then two global reductions.
    acc = acc_scr[...]
    col = jax.lax.broadcasted_iota(jnp.int32, (q, 1), 0) % ws
    acc_valid = acc * (col < wo).astype(jnp.float32)
    st_ref[0:1, :] = jnp.sum(acc_valid, axis=0, keepdims=True)
    st_ref[1:2, :] = jnp.sum(acc_valid * acc_valid, axis=0, keepdims=True)

    # Store the valid (ho, wo) window.
    for i in range(ho):
        o_ref[0, i, :, :] = acc_scr[pl.ds(i * ws, wo), :].astype(o_ref.dtype)


def _bn_add_bn_relu_kernel(x_ref, s_ref, b_ref, id_ref, si_ref, bi_ref, o_ref):
    o_ref[...] = jnp.maximum(
        x_ref[...].astype(jnp.float32) * s_ref[...] + b_ref[...]
        + id_ref[...].astype(jnp.float32) * si_ref[...] + bi_ref[...], 0.0)


def _bn_add_relu_id_kernel(x_ref, s_ref, b_ref, id_ref, o_ref):
    o_ref[...] = jnp.maximum(
        x_ref[...].astype(jnp.float32) * s_ref[...] + b_ref[...]
        + id_ref[...].astype(jnp.float32), 0.0)


# ----------------------------- Pallas wrappers -----------------------------

def pallas_mm_stats(a, w):
    m, k = a.shape
    c = w.shape[1]
    mp, tm = _padded_rows_and_tile(m)
    if mp != m:
        # Zero rows contribute exactly 0 to the BN partial sums.
        a = jnp.pad(a, ((0, mp - m), (0, 0)))
    g = mp // tm
    cost = pl.CostEstimate(
        flops=2 * mp * k * c, transcendentals=0,
        bytes_accessed=int(mp * k * 2 + k * c * 2 + mp * c * 2 + g * 8 * c * 4))
    out, st = pl.pallas_call(
        _mm_stats_kernel,
        out_shape=(jax.ShapeDtypeStruct((mp, c), jnp.bfloat16),
                   jax.ShapeDtypeStruct((g * 8, c), jnp.float32)),
        grid=(g,),
        in_specs=[pl.BlockSpec((tm, k), lambda i: (i, 0)),
                  pl.BlockSpec((k, c), lambda i: (0, 0))],
        out_specs=(pl.BlockSpec((tm, c), lambda i: (i, 0)),
                   pl.BlockSpec((8, c), lambda i: (i, 0))),
        compiler_params=_mosaic_params(),
        cost_estimate=cost,
    )(a, w)
    return (out if mp == m else out[:m]), st


def pallas_bnrelu_mm_stats(a, s, b, w):
    m, k = a.shape
    c = w.shape[1]
    tm = _row_tile(m)
    g = m // tm
    cost = pl.CostEstimate(
        flops=2 * m * k * c + 3 * m * k, transcendentals=0,
        bytes_accessed=int(m * k * 2 + 2 * k * 4 + k * c * 2 + m * c * 2
                           + g * 8 * c * 4))
    return pl.pallas_call(
        _bnrelu_mm_stats_kernel,
        out_shape=(jax.ShapeDtypeStruct((m, c), jnp.bfloat16),
                   jax.ShapeDtypeStruct((g * 8, c), jnp.float32)),
        grid=(g,),
        in_specs=[pl.BlockSpec((tm, k), lambda i: (i, 0)),
                  pl.BlockSpec((1, k), lambda i: (0, 0)),
                  pl.BlockSpec((1, k), lambda i: (0, 0)),
                  pl.BlockSpec((k, c), lambda i: (0, 0))],
        out_specs=(pl.BlockSpec((tm, c), lambda i: (i, 0)),
                   pl.BlockSpec((8, c), lambda i: (i, 0))),
        compiler_params=_mosaic_params(),
        cost_estimate=cost,
    )(a, s, b, w)


def pallas_conv3x3(xps, maskp, s1, b1, w9, n, ho, wo, ws, stride):
    ss, _, hw, cin = xps.shape
    cout = w9.shape[2]
    q = (ho - 1) * ws + wo
    kernel = functools.partial(_conv3x3_kernel, ho=ho, wo=wo, ws=ws,
                               stride=stride)
    cost = pl.CostEstimate(
        flops=2 * n * q * 9 * cin * cout, transcendentals=0,
        bytes_accessed=int(ss * n * hw * cin * 2 + ss * hw * 4
                           + 9 * cin * cout * 2 + n * ho * wo * cout * 2
                           + n * 8 * cout * 4))
    # TODO(synk): for v7x, additionally tile the grid over output-row blocks so
    # small batches still pipeline / shard across both TensorCores.
    return pl.pallas_call(
        kernel,
        out_shape=(jax.ShapeDtypeStruct((n, ho, wo, cout), jnp.bfloat16),
                   jax.ShapeDtypeStruct((n * 8, cout), jnp.float32)),
        grid=(n,),
        in_specs=[pl.BlockSpec((ss, 1, hw, cin), lambda i: (0, i, 0, 0)),
                  pl.BlockSpec((ss, 1, hw, 1), lambda i: (0, 0, 0, 0)),
                  pl.BlockSpec((1, cin), lambda i: (0, 0)),
                  pl.BlockSpec((1, cin), lambda i: (0, 0)),
                  pl.BlockSpec((9, cin, cout), lambda i: (0, 0, 0))],
        out_specs=(pl.BlockSpec((1, ho, wo, cout), lambda i: (i, 0, 0, 0)),
                   pl.BlockSpec((8, cout), lambda i: (i, 0))),
        scratch_shapes=[pltpu.VMEM((ss, hw, cin), jnp.bfloat16),
                        pltpu.VMEM((q, cout), jnp.float32)],
        compiler_params=_mosaic_params(),
        cost_estimate=cost,
    )(xps, maskp, s1, b1, w9)


def pallas_bn_add_bn_relu(x, s, b, idn, si, bi):
    m, c = x.shape
    tm = _row_tile(m)
    cost = pl.CostEstimate(flops=6 * m * c, transcendentals=0,
                           bytes_accessed=int(2 * m * c * 2 + 4 * c * 4
                                              + m * c * 4))
    return pl.pallas_call(
        _bn_add_bn_relu_kernel,
        out_shape=jax.ShapeDtypeStruct((m, c), jnp.float32),
        grid=(m // tm,),
        in_specs=[pl.BlockSpec((tm, c), lambda i: (i, 0)),
                  pl.BlockSpec((1, c), lambda i: (0, 0)),
                  pl.BlockSpec((1, c), lambda i: (0, 0)),
                  pl.BlockSpec((tm, c), lambda i: (i, 0)),
                  pl.BlockSpec((1, c), lambda i: (0, 0)),
                  pl.BlockSpec((1, c), lambda i: (0, 0))],
        out_specs=pl.BlockSpec((tm, c), lambda i: (i, 0)),
        compiler_params=_mosaic_params(),
        cost_estimate=cost,
    )(x, s, b, idn, si, bi)


def pallas_bn_add_relu_identity(x, s, b, idn):
    m, c = x.shape
    tm = _row_tile(m)
    cost = pl.CostEstimate(flops=4 * m * c, transcendentals=0,
                           bytes_accessed=int(m * c * 2 + 2 * c * 4
                                              + m * c * 4 + m * c * 4))
    return pl.pallas_call(
        _bn_add_relu_id_kernel,
        out_shape=jax.ShapeDtypeStruct((m, c), jnp.float32),
        grid=(m // tm,),
        in_specs=[pl.BlockSpec((tm, c), lambda i: (i, 0)),
                  pl.BlockSpec((1, c), lambda i: (0, 0)),
                  pl.BlockSpec((1, c), lambda i: (0, 0)),
                  pl.BlockSpec((tm, c), lambda i: (i, 0))],
        out_specs=pl.BlockSpec((tm, c), lambda i: (i, 0)),
        compiler_params=_mosaic_params(),
        cost_estimate=cost,
    )(x, s, b, idn)


# ------------------------------ forward pass --------------------------------

@functools.partial(jax.jit, static_argnums=(2, 3))
def bottleneck_forward(x_nchw, params, stride, is_downsample):
    """Pallas implementation of Bottleneck.forward (training-mode BN)."""
    n, c_in, h, w = x_nchw.shape
    x_nchw = x_nchw.astype(jnp.float32)
    # Single fused transpose + cast pass over x (NCHW -> NHWC bf16).
    x_bf = jnp.transpose(x_nchw, (0, 2, 3, 1)).astype(jnp.bfloat16)
    x2d_bf = x_bf.reshape(n * h * w, c_in)

    # ---- conv1 (1x1); BN1 partial stats ride out of the matmul ----
    w1 = params["w1"].reshape(c_in, -1).astype(jnp.bfloat16)
    m1 = w1.shape[1]
    raw1, st1 = pallas_mm_stats(x2d_bf, w1)
    s1, b1 = _stats_to_scale_bias(st1, n * h * w, params["g1"], params["b1"])

    # ---- conv2 (3x3, stride, pad=1); BN1+ReLU fused in-kernel, no im2col ----
    ho = (h + 2 - 3) // stride + 1
    wo = (w + 2 - 3) // stride + 1
    xp = jnp.pad(raw1.reshape(n, h, w, m1), ((0, 0), (1, 1), (1, 1), (0, 0)))
    xps = _parity_split_flat(xp, stride)                  # (s*s, n, Hs*Ws, m1)
    mask = jnp.pad(jnp.ones((1, h, w, 1), jnp.float32),
                   ((0, 0), (1, 1), (1, 1), (0, 0)))
    maskp = _parity_split_flat(mask, stride)              # (s*s, 1, Hs*Ws, 1)
    ws = -(-(w + 2) // stride)                            # padded plane width
    w2 = params["w2"].reshape(9, m1, -1).astype(jnp.bfloat16)
    m2 = w2.shape[2]
    raw2_4d, st2 = pallas_conv3x3(xps, maskp, s1, b1, w2, n, ho, wo, ws, stride)
    s2, b2 = _stats_to_scale_bias(st2, n * ho * wo, params["g2"], params["b2"])
    raw2 = raw2_4d.reshape(n * ho * wo, m2)

    # ---- conv3 (1x1); BN2+ReLU fused into the matmul input tile ----
    w3 = params["w3"].reshape(m2, -1).astype(jnp.bfloat16)
    c_out = w3.shape[1]
    raw3, st3 = pallas_bnrelu_mm_stats(raw2, s2, b2, w3)
    s3, b3 = _stats_to_scale_bias(st3, n * ho * wo, params["g3"], params["b3"])

    # ---- residual path + BN3 + add + ReLU ----
    if is_downsample:
        # Strided slice on the small NCHW tensor, then one fused transpose+cast.
        xs_bf = jnp.transpose(x_nchw[:, :, ::stride, ::stride],
                              (0, 2, 3, 1)).astype(jnp.bfloat16)
        xs2d = xs_bf.reshape(n * ho * wo, c_in)
        wd = params["wd"].reshape(c_in, -1).astype(jnp.bfloat16)
        rawd, std_ = pallas_mm_stats(xs2d, wd)
        sd, bd = _stats_to_scale_bias(std_, n * ho * wo,
                                      params["gd"], params["bd"])
        out2d = pallas_bn_add_bn_relu(raw3, s3, b3, rawd, sd, bd)
    else:
        if stride != 1 or c_in != c_out:
            raise ValueError("identity residual requires stride=1 and "
                             "matching input/output channels")
        xid = jnp.transpose(x_nchw, (0, 2, 3, 1)).reshape(n * h * w, c_in)
        out2d = pallas_bn_add_relu_identity(raw3, s3, b3, xid)

    out = out2d.reshape(n, ho, wo, c_out)
    # TODO(synk): fold this NHWC->NCHW transpose into the epilogue kernels
    # (layout-aware write) to remove one extra HBM pass over the result.
    return jnp.transpose(out, (0, 3, 1, 2))               # back to NCHW


# ------------------------------ parameters ----------------------------------

def init_bottleneck_params(key, inplanes, midplanes, planes, compress_rate,
                           is_downsample):
    c_in = math.ceil(inplanes * (1 - compress_rate[0]))
    m1 = math.ceil(midplanes * (1 - compress_rate[1]))
    m2 = math.ceil(midplanes * (1 - compress_rate[2]))
    c_out = math.ceil(planes * (1 - compress_rate[3]))
    ks = jax.random.split(key, 12)
    f32 = jnp.float32
    params = {
        "w1": 0.1 * jax.random.normal(ks[0], (1, 1, c_in, m1), f32),
        "g1": 1.0 + 0.1 * jax.random.normal(ks[1], (m1,), f32),
        "b1": 0.1 * jax.random.normal(ks[2], (m1,), f32),
        "w2": 0.1 * jax.random.normal(ks[3], (3, 3, m1, m2), f32),
        "g2": 1.0 + 0.1 * jax.random.normal(ks[4], (m2,), f32),
        "b2": 0.1 * jax.random.normal(ks[5], (m2,), f32),
        "w3": 0.1 * jax.random.normal(ks[6], (1, 1, m2, c_out), f32),
        "g3": 1.0 + 0.1 * jax.random.normal(ks[7], (c_out,), f32),
        "b3": 0.1 * jax.random.normal(ks[8], (c_out,), f32),
    }
    if is_downsample:
        params.update({
            "wd": 0.1 * jax.random.normal(ks[9], (1, 1, c_in, c_out), f32),
            "gd": 1.0 + 0.1 * jax.random.normal(ks[10], (c_out,), f32),
            "bd": 0.1 * jax.random.normal(ks[11], (c_out,), f32),
        })
    return params, (c_in, m1, m2, c_out)


# --------------------------- pure-JAX references -----------------------------

def _ref_conv_f32(x, w, stride, pad):
    return jax.lax.conv_general_dilated(
        x, w, (stride, stride), [(pad, pad), (pad, pad)],
        dimension_numbers=("NHWC", "HWIO", "NHWC"),
        precision=jax.lax.Precision.HIGHEST)


def _ref_bn_f32(y, gamma, beta):
    m = jnp.mean(y, axis=(0, 1, 2))
    v = jnp.mean((y - m) ** 2, axis=(0, 1, 2))
    return (y - m) / jnp.sqrt(v + _EPS) * gamma + beta


def bottleneck_reference_f32(x_nchw, p, stride, is_downsample):
    """Full-f32 (HIGHEST precision) semantic reference."""
    x = jnp.transpose(x_nchw, (0, 2, 3, 1)).astype(jnp.float32)
    out = jax.nn.relu(_ref_bn_f32(_ref_conv_f32(x, p["w1"], 1, 0),
                                  p["g1"], p["b1"]))
    out = jax.nn.relu(_ref_bn_f32(_ref_conv_f32(out, p["w2"], stride, 1),
                                  p["g2"], p["b2"]))
    out = _ref_bn_f32(_ref_conv_f32(out, p["w3"], 1, 0), p["g3"], p["b3"])
    idn = (_ref_bn_f32(_ref_conv_f32(x, p["wd"], stride, 0), p["gd"], p["bd"])
           if is_downsample else x)
    return jnp.transpose(jax.nn.relu(out + idn), (0, 3, 1, 2))


def _q_bf16(x):
    return x.astype(jnp.bfloat16).astype(jnp.float32)


def bottleneck_reference_bf16(x_nchw, p, stride, is_downsample):
    """Reference that mirrors the kernels' bf16 matmul / bf16 storage policy."""
    def conv(a, w, s_, pad):
        return jax.lax.conv_general_dilated(
            a.astype(jnp.bfloat16), w.astype(jnp.bfloat16), (s_, s_),
            [(pad, pad), (pad, pad)],
            dimension_numbers=("NHWC", "HWIO", "NHWC"),
            preferred_element_type=jnp.float32)

    def bnf(raw, g, b):
        m = jnp.mean(raw, axis=(0, 1, 2))
        v = jnp.mean((raw - m) ** 2, axis=(0, 1, 2))
        sc = g / jnp.sqrt(v + _EPS)
        bi = b - m * sc
        return _q_bf16(raw) * sc + bi

    x = jnp.transpose(x_nchw, (0, 2, 3, 1)).astype(jnp.float32)
    y1 = jax.nn.relu(bnf(conv(x, p["w1"], 1, 0), p["g1"], p["b1"]))
    y2 = jax.nn.relu(bnf(conv(y1, p["w2"], stride, 1), p["g2"], p["b2"]))
    o3 = bnf(conv(y2, p["w3"], 1, 0), p["g3"], p["b3"])
    idn = (bnf(conv(x, p["wd"], stride, 0), p["gd"], p["bd"])
           if is_downsample else x)
    return jnp.transpose(jax.nn.relu(o3 + idn), (0, 3, 1, 2))


# ---------------------------------- main ------------------------------------

def _check(out, ref_match, ref_full, shape):
    assert out.shape == shape, out.shape
    rel_m = float(jnp.linalg.norm(out - ref_match)
                  / (jnp.linalg.norm(ref_match) + 1e-12))
    rel_f = float(jnp.linalg.norm(out - ref_full)
                  / (jnp.linalg.norm(ref_full) + 1e-12))
    max_f = float(jnp.max(jnp.abs(out - ref_full)))
    assert rel_m < 5e-3, ("mismatch vs bf16-matched reference", rel_m)
    assert rel_f < 3e-2, ("mismatch vs f32 reference", rel_f)
    assert max_f < 1.5e-1, ("max-abs vs f32 reference", max_f)


if __name__ == "__main__":
    key = jax.random.PRNGKey(0)
    kx, kp1, kp2 = jax.random.split(key, 3)

    N, C_IN, H, W = 2, 16, 8, 8
    x = jax.random.normal(kx, (N, C_IN, H, W), jnp.float32)   # NCHW, like torch

    # Config A: downsample block, stride 2, with channel compression (ceil).
    params_a, _ = init_bottleneck_params(
        kp1, inplanes=16, midplanes=8, planes=32,
        compress_rate=(0.0, 0.25, 0.25, 0.0), is_downsample=True)
    out_a = bottleneck_forward(x, params_a, 2, True)
    jax.block_until_ready(out_a)
    _check(out_a,
           bottleneck_reference_bf16(x, params_a, 2, True),
           bottleneck_reference_f32(x, params_a, 2, True),
           (2, 32, 4, 4))

    # Config B: identity residual, stride 1, no compression.
    params_b, _ = init_bottleneck_params(
        kp2, inplanes=16, midplanes=8, planes=16,
        compress_rate=(0.0, 0.0, 0.0, 0.0), is_downsample=False)
    out_b = bottleneck_forward(x, params_b, 1, False)
    jax.block_until_ready(out_b)
    _check(out_b,
           bottleneck_reference_bf16(x, params_b, 1, False),
           bottleneck_reference_f32(x, params_b, 1, False),
           (2, 16, 8, 8))

    # TODO(synk): BatchNorm running_mean/running_var momentum updates (module
    # state) are not produced; only the forward output is computed.
    print("KERNEL_OK")
</pallas_src>

<mosaic_0001>
module attributes {stable_mosaic.version = 11 : i64} {
  func.func @_mm_stats_kernel(%arg0: i32, %arg1: memref<64x16xbf16, #tpu.memory_space<vmem>>, %arg2: memref<16x6xbf16, #tpu.memory_space<vmem>>, %arg3: memref<64x6xbf16, #tpu.memory_space<vmem>>, %arg4: memref<8x6xf32, #tpu.memory_space<vmem>>) attributes {dimension_semantics = [#tpu.dimension_semantics<parallel>], iteration_bounds = array<i64: 2>, scalar_prefetch = 0 : i64, scratch_operands = 0 : i64, tpu.core_type = #tpu.core_type<tc>, window_params = [{transform_indices = @transform_0, window_bounds = array<i64: 64, 16>}, {pipeline_mode = #tpu.pipeline_mode<synchronous>, transform_indices = @transform_1, window_bounds = array<i64: 16, 6>}, {transform_indices = @transform_2, window_bounds = array<i64: 64, 6>}, {transform_indices = @transform_3, window_bounds = array<i64: 8, 6>}]} {
    %c0 = arith.constant 0 : index
    %c0_0 = arith.constant 0 : index
    %0 = vector.load %arg1[%c0, %c0_0] : memref<64x16xbf16, #tpu.memory_space<vmem>>, vector<64x16xbf16>
    %c0_1 = arith.constant 0 : index
    %c0_2 = arith.constant 0 : index
    %1 = vector.load %arg2[%c0_1, %c0_2] : memref<16x6xbf16, #tpu.memory_space<vmem>>, vector<16x6xbf16>
    %cst = arith.constant dense<0.000000e+00> : vector<64x6xf32>
    %2 = tpu.matmul %0, %1, %cst {dimension_numbers = #tpu.dot_dimension_numbers<[1], [0], [0], [1], [0, 0, 1, 1], [], []>} : vector<64x16xbf16>, vector<16x6xbf16>, vector<64x6xf32> -> vector<64x6xf32>
    %3 = arith.truncf %2 : vector<64x6xf32> to vector<64x6xbf16>
    %c0_3 = arith.constant 0 : index
    %c0_4 = arith.constant 0 : index
    %4 = vector.load %arg3[%c0_3, %c0_4] : memref<64x6xbf16, #tpu.memory_space<vmem>>, vector<64x6xbf16>
    tpu.vector_store %arg3[%c0_3, %c0_4], %3 {strides = array<i32>} : memref<64x6xbf16, #tpu.memory_space<vmem>>, vector<64x6xbf16>,
    %cst_5 = arith.constant dense<0.000000e+00> : vector<6xf32>
    %5 = vector.multi_reduction <add>, %2, %cst_5 [0] : vector<64x6xf32> to vector<6xf32>
    %6 = vector.shape_cast %5 : vector<6xf32> to vector<1x6xf32>
    %c0_6 = arith.constant 0 : index
    %c0_7 = arith.constant 0 : index
    %7 = vector.load %arg4[%c0_6, %c0_7] : memref<8x6xf32, #tpu.memory_space<vmem>>, vector<1x6xf32>
    tpu.vector_store %arg4[%c0_6, %c0_7], %6 {strides = array<i32>} : memref<8x6xf32, #tpu.memory_space<vmem>>, vector<1x6xf32>,
    %8 = arith.mulf %2, %2 : vector<64x6xf32>
    %cst_8 = arith.constant dense<0.000000e+00> : vector<6xf32>
    %9 = vector.multi_reduction <add>, %8, %cst_8 [0] : vector<64x6xf32> to vector<6xf32>
    %10 = vector.shape_cast %9 : vector<6xf32> to vector<1x6xf32>
    %c1 = arith.constant 1 : index
    %c0_9 = arith.constant 0 : index
    %11 = vector.load %arg4[%c1, %c0_9] : memref<8x6xf32, #tpu.memory_space<vmem>>, vector<1x6xf32>
    tpu.vector_store %arg4[%c1, %c0_9], %10 {strides = array<i32>} : memref<8x6xf32, #tpu.memory_space<vmem>>, vector<1x6xf32>,
    return
  }
  func.func @transform_0(%arg0: i32) -> (i32, i32) {
    %c0_i32 = arith.constant 0 : i32
    %c0_i32_0 = arith.constant 0 : i32
    return %arg0, %c0_i32 : i32, i32
  }
  func.func @transform_1(%arg0: i32) -> (i32, i32) {
    %c0_i32 = arith.constant 0 : i32
    %c0_i32_0 = arith.constant 0 : i32
    %c0_i32_1 = arith.constant 0 : i32
    return %c0_i32, %c0_i32_0 : i32, i32
  }
  func.func @transform_2(%arg0: i32) -> (i32, i32) {
    %c0_i32 = arith.constant 0 : i32
    %c0_i32_0 = arith.constant 0 : i32
    return %arg0, %c0_i32 : i32, i32
  }
  func.func @transform_3(%arg0: i32) -> (i32, i32) {
    %c0_i32 = arith.constant 0 : i32
    %c0_i32_0 = arith.constant 0 : i32
    return %arg0, %c0_i32 : i32, i32
  }
}

module attributes {stable_mosaic.version = 11 : i64} {
  func.func @_mm_stats_kernel(%arg0: i32, %arg1: memref<16x16xbf16, #tpu.memory_space<vmem>>, %arg2: memref<16x32xbf16, #tpu.memory_space<vmem>>, %arg3: memref<16x32xbf16, #tpu.memory_space<vmem>>, %arg4: memref<8x32xf32, #tpu.memory_space<vmem>>) attributes {dimension_semantics = [#tpu.dimension_semantics<parallel>], iteration_bounds = array<i64: 2>, scalar_prefetch = 0 : i64, scratch_operands = 0 : i64, tpu.core_type = #tpu.core_type<tc>, window_params = [{transform_indices = @transform_0, window_bounds = array<i64: 16, 16>}, {pipeline_mode = #tpu.pipeline_mode<synchronous>, transform_indices = @transform_1, window_bounds = array<i64: 16, 32>}, {transform_indices = @transform_2, window_bounds = array<i64: 16, 32>}, {transform_indices = @transform_3, window_bounds = array<i64: 8, 32>}]} {
    %c0 = arith.constant 0 : index
    %c0_0 = arith.constant 0 : index
    %0 = vector.load %arg1[%c0, %c0_0] : memref<16x16xbf16, #tpu.memory_space<vmem>>, vector<16x16xbf16>
    %c0_1 = arith.constant 0 : index
    %c0_2 = arith.constant 0 : index
    %1 = vector.load %arg2[%c0_1, %c0_2] : memref<16x32xbf16, #tpu.memory_space<vmem>>, vector<16x32xbf16>
    %cst = arith.constant dense<0.000000e+00> : vector<16x32xf32>
    %2 = tpu.matmul %0, %1, %cst {dimension_numbers = #tpu.dot_dimension_numbers<[1], [0], [0], [1], [0, 0, 1, 1], [], []>} : vector<16x16xbf16>, vector<16x32xbf16>, vector<16x32xf32> -> vector<16x32xf32>
    %3 = arith.truncf %2 : vector<16x32xf32> to vector<16x32xbf16>
    %c0_3 = arith.constant 0 : index
    %c0_4 = arith.constant 0 : index
    %4 = vector.load %arg3[%c0_3, %c0_4] : memref<16x32xbf16, #tpu.memory_space<vmem>>, vector<16x32xbf16>
    tpu.vector_store %arg3[%c0_3, %c0_4], %3 {strides = array<i32>} : memref<16x32xbf16, #tpu.memory_space<vmem>>, vector<16x32xbf16>,
    %cst_5 = arith.constant dense<0.000000e+00> : vector<32xf32>
    %5 = vector.multi_reduction <add>, %2, %cst_5 [0] : vector<16x32xf32> to vector<32xf32>
    %6 = vector.shape_cast %5 : vector<32xf32> to vector<1x32xf32>
    %c0_6 = arith.constant 0 : index
    %c0_7 = arith.constant 0 : index
    %7 = vector.load %arg4[%c0_6, %c0_7] : memref<8x32xf32, #tpu.memory_space<vmem>>, vector<1x32xf32>
    tpu.vector_store %arg4[%c0_6, %c0_7], %6 {strides = array<i32>} : memref<8x32xf32, #tpu.memory_space<vmem>>, vector<1x32xf32>,
    %8 = arith.mulf %2, %2 : vector<16x32xf32>
    %cst_8 = arith.constant dense<0.000000e+00> : vector<32xf32>
    %9 = vector.multi_reduction <add>, %8, %cst_8 [0] : vector<16x32xf32> to vector<32xf32>
    %10 = vector.shape_cast %9 : vector<32xf32> to vector<1x32xf32>
    %c1 = arith.constant 1 : index
    %c0_9 = arith.constant 0 : index
    %11 = vector.load %arg4[%c1, %c0_9] : memref<8x32xf32, #tpu.memory_space<vmem>>, vector<1x32xf32>
    tpu.vector_store %arg4[%c1, %c0_9], %10 {strides = array<i32>} : memref<8x32xf32, #tpu.memory_space<vmem>>, vector<1x32xf32>,
    return
  }
  func.func @transform_0(%arg0: i32) -> (i32, i32) {
    %c0_i32 = arith.constant 0 : i32
    %c0_i32_0 = arith.constant 0 : i32
    return %arg0, %c0_i32 : i32, i32
  }
  func.func @transform_1(%arg0: i32) -> (i32, i32) {
    %c0_i32 = arith.constant 0 : i32
    %c0_i32_0 = arith.constant 0 : i32
    %c0_i32_1 = arith.constant 0 : i32
    return %c0_i32, %c0_i32_0 : i32, i32
  }
  func.func @transform_2(%arg0: i32) -> (i32, i32) {
    %c0_i32 = arith.constant 0 : i32
    %c0_i32_0 = arith.constant 0 : i32
    return %arg0, %c0_i32 : i32, i32
  }
  func.func @transform_3(%arg0: i32) -> (i32, i32) {
    %c0_i32 = arith.constant 0 : i32
    %c0_i32_0 = arith.constant 0 : i32
    return %arg0, %c0_i32 : i32, i32
  }
}

module attributes {stable_mosaic.version = 11 : i64} {
  func.func @_bnrelu_mm_stats_kernel(%arg0: i32, %arg1: memref<16x6xbf16, #tpu.memory_space<vmem>>, %arg2: memref<1x6xf32, #tpu.memory_space<vmem>>, %arg3: memref<1x6xf32, #tpu.memory_space<vmem>>, %arg4: memref<6x32xbf16, #tpu.memory_space<vmem>>, %arg5: memref<16x32xbf16, #tpu.memory_space<vmem>>, %arg6: memref<8x32xf32, #tpu.memory_space<vmem>>) attributes {dimension_semantics = [#tpu.dimension_semantics<parallel>], iteration_bounds = array<i64: 2>, scalar_prefetch = 0 : i64, scratch_operands = 0 : i64, tpu.core_type = #tpu.core_type<tc>, window_params = [{transform_indices = @transform_0, window_bounds = array<i64: 16, 6>}, {pipeline_mode = #tpu.pipeline_mode<synchronous>, transform_indices = @transform_1, window_bounds = array<i64: 1, 6>}, {pipeline_mode = #tpu.pipeline_mode<synchronous>, transform_indices = @transform_2, window_bounds = array<i64: 1, 6>}, {pipeline_mode = #tpu.pipeline_mode<synchronous>, transform_indices = @transform_3, window_bounds = array<i64: 6, 32>}, {transform_indices = @transform_4, window_bounds = array<i64: 16, 32>}, {transform_indices = @transform_5, window_bounds = array<i64: 8, 32>}]} {
    %c0 = arith.constant 0 : index
    %c0_0 = arith.constant 0 : index
    %0 = vector.load %arg1[%c0, %c0_0] : memref<16x6xbf16, #tpu.memory_space<vmem>>, vector<16x6xbf16>
    %1 = arith.extf %0 : vector<16x6xbf16> to vector<16x6xf32>
    %c0_1 = arith.constant 0 : index
    %c0_2 = arith.constant 0 : index
    %2 = vector.load %arg2[%c0_1, %c0_2] : memref<1x6xf32, #tpu.memory_space<vmem>>, vector<1x6xf32>
    %3 = vector.broadcast %2 : vector<1x6xf32> to vector<16x6xf32>
    %4 = arith.mulf %1, %3 : vector<16x6xf32>
    %c0_3 = arith.constant 0 : index
    %c0_4 = arith.constant 0 : index
    %5 = vector.load %arg3[%c0_3, %c0_4] : memref<1x6xf32, #tpu.memory_space<vmem>>, vector<1x6xf32>
    %6 = vector.broadcast %5 : vector<1x6xf32> to vector<16x6xf32>
    %7 = arith.addf %4, %6 : vector<16x6xf32>
    %cst = arith.constant 0.000000e+00 : f32
    %8 = vector.broadcast %cst : f32 to vector<16x6xf32>
    %9 = arith.maximumf %7, %8 : vector<16x6xf32>
    %10 = arith.truncf %9 : vector<16x6xf32> to vector<16x6xbf16>
    %c0_5 = arith.constant 0 : index
    %c0_6 = arith.constant 0 : index
    %11 = vector.load %arg4[%c0_5, %c0_6] : memref<6x32xbf16, #tpu.memory_space<vmem>>, vector<6x32xbf16>
    %cst_7 = arith.constant dense<0.000000e+00> : vector<16x32xf32>
    %12 = tpu.matmul %10, %11, %cst_7 {dimension_numbers = #tpu.dot_dimension_numbers<[1], [0], [0], [1], [0, 0, 1, 1], [], []>} : vector<16x6xbf16>, vector<6x32xbf16>, vector<16x32xf32> -> vector<16x32xf32>
    %13 = arith.truncf %12 : vector<16x32xf32> to vector<16x32xbf16>
    %c0_8 = arith.constant 0 : index
    %c0_9 = arith.constant 0 : index
    %14 = vector.load %arg5[%c0_8, %c0_9] : memref<16x32xbf16, #tpu.memory_space<vmem>>, vector<16x32xbf16>
    tpu.vector_store %arg5[%c0_8, %c0_9], %13 {strides = array<i32>} : memref<16x32xbf16, #tpu.memory_space<vmem>>, vector<16x32xbf16>,
    %cst_10 = arith.constant dense<0.000000e+00> : vector<32xf32>
    %15 = vector.multi_reduction <add>, %12, %cst_10 [0] : vector<16x32xf32> to vector<32xf32>
    %16 = vector.shape_cast %15 : vector<32xf32> to vector<1x32xf32>
    %c0_11 = arith.constant 0 : index
    %c0_12 = arith.constant 0 : index
    %17 = vector.load %arg6[%c0_11, %c0_12] : memref<8x32xf32, #tpu.memory_space<vmem>>, vector<1x32xf32>
    tpu.vector_store %arg6[%c0_11, %c0_12], %16 {strides = array<i32>} : memref<8x32xf32, #tpu.memory_space<vmem>>, vector<1x32xf32>,
    %18 = arith.mulf %12, %12 : vector<16x32xf32>
    %cst_13 = arith.constant dense<0.000000e+00> : vector<32xf32>
    %19 = vector.multi_reduction <add>, %18, %cst_13 [0] : vector<16x32xf32> to vector<32xf32>
    %20 = vector.shape_cast %19 : vector<32xf32> to vector<1x32xf32>
    %c1 = arith.constant 1 : index
    %c0_14 = arith.constant 0 : index
    %21 = vector.load %arg6[%c1, %c0_14] : memref<8x32xf32, #tpu.memory_space<vmem>>, vector<1x32xf32>
    tpu.vector_store %arg6[%c1, %c0_14], %20 {strides = array<i32>} : memref<8x32xf32, #tpu.memory_space<vmem>>, vector<1x32xf32>,
    return
  }
  func.func @transform_0(%arg0: i32) -> (i32, i32) {
    %c0_i32 = arith.constant 0 : i32
    %c0_i32_0 = arith.constant 0 : i32
    return %arg0, %c0_i32 : i32, i32
  }
  func.func @transform_1(%arg0: i32) -> (i32, i32) {
    %c0_i32 = arith.constant 0 : i32
    %c0_i32_0 = arith.constant 0 : i32
    %c0_i32_1 = arith.constant 0 : i32
    return %c0_i32, %c0_i32_0 : i32, i32
  }
  func.func @transform_2(%arg0: i32) -> (i32, i32) {
    %c0_i32 = arith.constant 0 : i32
    %c0_i32_0 = arith.constant 0 : i32
    %c0_i32_1 = arith.constant 0 : i32
    return %c0_i32, %c0_i32_0 : i32, i32
  }
  func.func @transform_3(%arg0: i32) -> (i32, i32) {
    %c0_i32 = arith.constant 0 : i32
    %c0_i32_0 = arith.constant 0 : i32
    %c0_i32_1 = arith.constant 0 : i32
    return %c0_i32, %c0_i32_0 : i32, i32
  }
  func.func @transform_4(%arg0: i32) -> (i32, i32) {
    %c0_i32 = arith.constant 0 : i32
    %c0_i32_0 = arith.constant 0 : i32
    return %arg0, %c0_i32 : i32, i32
  }
  func.func @transform_5(%arg0: i32) -> (i32, i32) {
    %c0_i32 = arith.constant 0 : i32
    %c0_i32_0 = arith.constant 0 : i32
    return %arg0, %c0_i32 : i32, i32
  }
}

module attributes {stable_mosaic.version = 11 : i64} {
  func.func @_conv3x3_kernel(%arg0: i32, %arg1: memref<4x1x25x6xbf16, #tpu.memory_space<vmem>>, %arg2: memref<4x1x25x1xf32, #tpu.memory_space<vmem>>, %arg3: memref<1x6xf32, #tpu.memory_space<vmem>>, %arg4: memref<1x6xf32, #tpu.memory_space<vmem>>, %arg5: memref<9x6x6xbf16, #tpu.memory_space<vmem>>, %arg6: memref<1x4x4x6xbf16, #tpu.memory_space<vmem>>, %arg7: memref<8x6xf32, #tpu.memory_space<vmem>>, %arg8: memref<4x25x6xbf16, #tpu.memory_space<vmem>>, %arg9: memref<19x6xf32, #tpu.memory_space<vmem>>) attributes {dimension_semantics = [#tpu.dimension_semantics<parallel>], iteration_bounds = array<i64: 2>, scalar_prefetch = 0 : i64, scratch_operands = 2 : i64, tpu.core_type = #tpu.core_type<tc>, window_params = [{transform_indices = @transform_0, window_bounds = array<i64: 4, 1, 25, 6>}, {pipeline_mode = #tpu.pipeline_mode<synchronous>, transform_indices = @transform_1, window_bounds = array<i64: 4, 1, 25, 1>}, {pipeline_mode = #tpu.pipeline_mode<synchronous>, transform_indices = @transform_2, window_bounds = array<i64: 1, 6>}, {pipeline_mode = #tpu.pipeline_mode<synchronous>, transform_indices = @transform_3, window_bounds = array<i64: 1, 6>}, {pipeline_mode = #tpu.pipeline_mode<synchronous>, transform_indices = @transform_4, window_bounds = array<i64: 9, 6, 6>}, {transform_indices = @transform_5, window_bounds = array<i64: 1, 4, 4, 6>}, {transform_indices = @transform_6, window_bounds = array<i64: 8, 6>}]} {
    %c0 = arith.constant 0 : index
    %c0_0 = arith.constant 0 : index
    %0 = vector.load %arg3[%c0, %c0_0] : memref<1x6xf32, #tpu.memory_space<vmem>>, vector<1x6xf32>
    %c0_1 = arith.constant 0 : index
    %c0_2 = arith.constant 0 : index
    %1 = vector.load %arg4[%c0_1, %c0_2] : memref<1x6xf32, #tpu.memory_space<vmem>>, vector<1x6xf32>
    %c0_3 = arith.constant 0 : index
    %c0_4 = arith.constant 0 : index
    %c0_5 = arith.constant 0 : index
    %c0_6 = arith.constant 0 : index
    %2 = vector.load %arg1[%c0_3, %c0_4, %c0_5, %c0_6] : memref<4x1x25x6xbf16, #tpu.memory_space<vmem>>, vector<1x1x25x6xbf16>
    %3 = vector.shape_cast %2 : vector<1x1x25x6xbf16> to vector<25x6xbf16>
    %4 = arith.extf %3 : vector<25x6xbf16> to vector<25x6xf32>
    %5 = vector.broadcast %0 : vector<1x6xf32> to vector<25x6xf32>
    %6 = arith.mulf %4, %5 : vector<25x6xf32>
    %7 = vector.broadcast %1 : vector<1x6xf32> to vector<25x6xf32>
    %8 = arith.addf %6, %7 : vector<25x6xf32>
    %cst = arith.constant 0.000000e+00 : f32
    %9 = vector.broadcast %cst : f32 to vector<25x6xf32>
    %10 = arith.maximumf %8, %9 : vector<25x6xf32>
    %c0_7 = arith.constant 0 : index
    %c0_8 = arith.constant 0 : index
    %c0_9 = arith.constant 0 : index
    %c0_10 = arith.constant 0 : index
    %11 = vector.load %arg2[%c0_7, %c0_8, %c0_9, %c0_10] : memref<4x1x25x1xf32, #tpu.memory_space<vmem>>, vector<1x1x25x1xf32>
    %12 = vector.shape_cast %11 : vector<1x1x25x1xf32> to vector<25x1xf32>
    %13 = vector.broadcast %12 : vector<25x1xf32> to vector<25x6xf32>
    %14 = arith.mulf %10, %13 : vector<25x6xf32>
    %15 = arith.truncf %14 : vector<25x6xf32> to vector<25x6xbf16>
    %c0_11 = arith.constant 0 : index
    %c0_12 = arith.constant 0 : index
    %c0_13 = arith.constant 0 : index
    %16 = vector.load %arg8[%c0_11, %c0_12, %c0_13] : memref<4x25x6xbf16, #tpu.memory_space<vmem>>, vector<1x25x6xbf16>
    %17 = vector.shape_cast %16 : vector<1x25x6xbf16> to vector<25x6xbf16>
    %18 = vector.shape_cast %15 : vector<25x6xbf16> to vector<1x25x6xbf16>
    tpu.vector_store %arg8[%c0_11, %c0_12, %c0_13], %18 {strides = array<i32>} : memref<4x25x6xbf16, #tpu.memory_space<vmem>>, vector<1x25x6xbf16>,
    %c1 = arith.constant 1 : index
    %c0_14 = arith.constant 0 : index
    %c0_15 = arith.constant 0 : index
    %c0_16 = arith.constant 0 : index
    %19 = vector.load %arg1[%c1, %c0_14, %c0_15, %c0_16] : memref<4x1x25x6xbf16, #tpu.memory_space<vmem>>, vector<1x1x25x6xbf16>
    %20 = vector.shape_cast %19 : vector<1x1x25x6xbf16> to vector<25x6xbf16>
    %21 = arith.extf %20 : vector<25x6xbf16> to vector<25x6xf32>
    %22 = vector.broadcast %0 : vector<1x6xf32> to vector<25x6xf32>
    %23 = arith.mulf %21, %22 : vector<25x6xf32>
    %24 = vector.broadcast %1 : vector<1x6xf32> to vector<25x6xf32>
    %25 = arith.addf %23, %24 : vector<25x6xf32>
    %cst_17 = arith.constant 0.000000e+00 : f32
    %26 = vector.broadcast %cst_17 : f32 to vector<25x6xf32>
    %27 = arith.maximumf %25, %26 : vector<25x6xf32>
    %c1_18 = arith.constant 1 : index
    %c0_19 = arith.constant 0 : index
    %c0_20 = arith.constant 0 : index
    %c0_21 = arith.constant 0 : index
    %28 = vector.load %arg2[%c1_18, %c0_19, %c0_20, %c0_21] : memref<4x1x25x1xf32, #tpu.memory_space<vmem>>, vector<1x1x25x1xf32>
    %29 = vector.shape_cast %28 : vector<1x1x25x1xf32> to vector<25x1xf32>
    %30 = vector.broadcast %29 : vector<25x1xf32> to vector<25x6xf32>
    %31 = arith.mulf %27, %30 : vector<25x6xf32>
    %32 = arith.truncf %31 : vector<25x6xf32> to vector<25x6xbf16>
    %c1_22 = arith.constant 1 : index
    %c0_23 = arith.constant 0 : index
    %c0_24 = arith.constant 0 : index
    %33 = vector.load %arg8[%c1_22, %c0_23, %c0_24] : memref<4x25x6xbf16, #tpu.memory_space<vmem>>, vector<1x25x6xbf16>
    %34 = vector.shape_cast %33 : vector<1x25x6xbf16> to vector<25x6xbf16>
    %35 = vector.shape_cast %32 : vector<25x6xbf16> to vector<1x25x6xbf16>
    tpu.vector_store %arg8[%c1_22, %c0_23, %c0_24], %35 {strides = array<i32>} : memref<4x25x6xbf16, #tpu.memory_space<vmem>>, vector<1x25x6xbf16>,
    %c2 = arith.constant 2 : index
    %c0_25 = arith.constant 0 : index
    %c0_26 = arith.constant 0 : index
    %c0_27 = arith.constant 0 : index
    %36 = vector.load %arg1[%c2, %c0_25, %c0_26, %c0_27] : memref<4x1x25x6xbf16, #tpu.memory_space<vmem>>, vector<1x1x25x6xbf16>
    %37 = vector.shape_cast %36 : vector<1x1x25x6xbf16> to vector<25x6xbf16>
    %38 = arith.extf %37 : vector<25x6xbf16> to vector<25x6xf32>
    %39 = vector.broadcast %0 : vector<1x6xf32> to vector<25x6xf32>
    %40 = arith.mulf %38, %39 : vector<25x6xf32>
    %41 = vector.broadcast %1 : vector<1x6xf32> to vector<25x6xf32>
    %42 = arith.addf %40, %41 : vector<25x6xf32>
    %cst_28 = arith.constant 0.000000e+00 : f32
    %43 = vector.broadcast %cst_28 : f32 to vector<25x6xf32>
    %44 = arith.maximumf %42, %43 : vector<25x6xf32>
    %c2_29 = arith.constant 2 : index
    %c0_30 = arith.constant 0 : index
    %c0_31 = arith.constant 0 : index
    %c0_32 = arith.constant 0 : index
    %45 = vector.load %arg2[%c2_29, %c0_30, %c0_31, %c0_32] : memref<4x1x25x1xf32, #tpu.memory_space<vmem>>, vector<1x1x25x1xf32>
    %46 = vector.shape_cast %45 : vector<1x1x25x1xf32> to vector<25x1xf32>
    %47 = vector.broadcast %46 : vector<25x1xf32> to vector<25x6xf32>
    %48 = arith.mulf %44, %47 : vector<25x6xf32>
    %49 = arith.truncf %48 : vector<25x6xf32> to vector<25x6xbf16>
    %c2_33 = arith.constant 2 : index
    %c0_34 = arith.constant 0 : index
    %c0_35 = arith.constant 0 : index
    %50 = vector.load %arg8[%c2_33, %c0_34, %c0_35] : memref<4x25x6xbf16, #tpu.memory_space<vmem>>, vector<1x25x6xbf16>
    %51 = vector.shape_cast %50 : vector<1x25x6xbf16> to vector<25x6xbf16>
    %52 = vector.shape_cast %49 : vector<25x6xbf16> to vector<1x25x6xbf16>
    tpu.vector_store %arg8[%c2_33, %c0_34, %c0_35], %52 {strides = array<i32>} : memref<4x25x6xbf16, #tpu.memory_space<vmem>>, vector<1x25x6xbf16>,
    %c3 = arith.constant 3 : index
    %c0_36 = arith.constant 0 : index
    %c0_37 = arith.constant 0 : index
    %c0_38 = arith.constant 0 : index
    %53 = vector.load %arg1[%c3, %c0_36, %c0_37, %c0_38] : memref<4x1x25x6xbf16, #tpu.memory_space<vmem>>, vector<1x1x25x6xbf16>
    %54 = vector.shape_cast %53 : vector<1x1x25x6xbf16> to vector<25x6xbf16>
    %55 = arith.extf %54 : vector<25x6xbf16> to vector<25x6xf32>
    %56 = vector.broadcast %0 : vector<1x6xf32> to vector<25x6xf32>
    %57 = arith.mulf %55, %56 : vector<25x6xf32>
    %58 = vector.broadcast %1 : vector<1x6xf32> to vector<25x6xf32>
    %59 = arith.addf %57, %58 : vector<25x6xf32>
    %cst_39 = arith.constant 0.000000e+00 : f32
    %60 = vector.broadcast %cst_39 : f32 to vector<25x6xf32>
    %61 = arith.maximumf %59, %60 : vector<25x6xf32>
    %c3_40 = arith.constant 3 : index
    %c0_41 = arith.constant 0 : index
    %c0_42 = arith.constant 0 : index
    %c0_43 = arith.constant 0 : index
    %62 = vector.load %arg2[%c3_40, %c0_41, %c0_42, %c0_43] : memref<4x1x25x1xf32, #tpu.memory_space<vmem>>, vector<1x1x25x1xf32>
    %63 = vector.shape_cast %62 : vector<1x1x25x1xf32> to vector<25x1xf32>
    %64 = vector.broadcast %63 : vector<25x1xf32> to vector<25x6xf32>
    %65 = arith.mulf %61, %64 : vector<25x6xf32>
    %66 = arith.truncf %65 : vector<25x6xf32> to vector<25x6xbf16>
    %c3_44 = arith.constant 3 : index
    %c0_45 = arith.constant 0 : index
    %c0_46 = arith.constant 0 : index
    %67 = vector.load %arg8[%c3_44, %c0_45, %c0_46] : memref<4x25x6xbf16, #tpu.memory_space<vmem>>, vector<1x25x6xbf16>
    %68 = vector.shape_cast %67 : vector<1x25x6xbf16> to vector<25x6xbf16>
    %69 = vector.shape_cast %66 : vector<25x6xbf16> to vector<1x25x6xbf16>
    tpu.vector_store %arg8[%c3_44, %c0_45, %c0_46], %69 {strides = array<i32>} : memref<4x25x6xbf16, #tpu.memory_space<vmem>>, vector<1x25x6xbf16>,
    %c0_47 = arith.constant 0 : index
    %c0_48 = arith.constant 0 : index
    %c0_49 = arith.constant 0 : index
    %70 = vector.load %arg8[%c0_47, %c0_48, %c0_49] : memref<4x25x6xbf16, #tpu.memory_space<vmem>>, vector<1x19x6xbf16>
    %71 = vector.shape_cast %70 : vector<1x19x6xbf16> to vector<19x6xbf16>
    %c0_50 = arith.constant 0 : index
    %c0_51 = arith.constant 0 : index
    %c0_52 = arith.constant 0 : index
    %72 = vector.load %arg5[%c0_50, %c0_51, %c0_52] : memref<9x6x6xbf16, #tpu.memory_space<vmem>>, vector<1x6x6xbf16>
    %73 = vector.shape_cast %72 : vector<1x6x6xbf16> to vector<6x6xbf16>
    %cst_53 = arith.constant dense<0.000000e+00> : vector<19x6xf32>
    %74 = tpu.matmul %71, %73, %cst_53 {dimension_numbers = #tpu.dot_dimension_numbers<[1], [0], [0], [1], [0, 0, 1, 1], [], []>} : vector<19x6xbf16>, vector<6x6xbf16>, vector<19x6xf32> -> vector<19x6xf32>
    %c0_54 = arith.constant 0 : index
    %c0_55 = arith.constant 0 : index
    %75 = vector.load %arg9[%c0_54, %c0_55] : memref<19x6xf32, #tpu.memory_space<vmem>>, vector<19x6xf32>
    tpu.vector_store %arg9[%c0_54, %c0_55], %74 {strides = array<i32>} : memref<19x6xf32, #tpu.memory_space<vmem>>, vector<19x6xf32>,
    %c1_56 = arith.constant 1 : index
    %c0_57 = arith.constant 0 : index
    %c0_58 = arith.constant 0 : index
    %76 = vector.load %arg8[%c1_56, %c0_57, %c0_58] : memref<4x25x6xbf16, #tpu.memory_space<vmem>>, vector<1x19x6xbf16>
    %77 = vector.shape_cast %76 : vector<1x19x6xbf16> to vector<19x6xbf16>
    %c1_59 = arith.constant 1 : index
    %c0_60 = arith.constant 0 : index
    %c0_61 = arith.constant 0 : index
    %78 = vector.load %arg5[%c1_59, %c0_60, %c0_61] : memref<9x6x6xbf16, #tpu.memory_space<vmem>>, vector<1x6x6xbf16>
    %79 = vector.shape_cast %78 : vector<1x6x6xbf16> to vector<6x6xbf16>
    %cst_62 = arith.constant dense<0.000000e+00> : vector<19x6xf32>
    %80 = tpu.matmul %77, %79, %cst_62 {dimension_numbers = #tpu.dot_dimension_numbers<[1], [0], [0], [1], [0, 0, 1, 1], [], []>} : vector<19x6xbf16>, vector<6x6xbf16>, vector<19x6xf32> -> vector<19x6xf32>
    %c0_63 = arith.constant 0 : index
    %c0_64 = arith.constant 0 : index
    %81 = vector.load %arg9[%c0_63, %c0_64] : memref<19x6xf32, #tpu.memory_space<vmem>>, vector<19x6xf32>
    %82 = arith.addf %81, %80 : vector<19x6xf32>
    %c0_65 = arith.constant 0 : index
    %c0_66 = arith.constant 0 : index
    %83 = vector.load %arg9[%c0_65, %c0_66] : memref<19x6xf32, #tpu.memory_space<vmem>>, vector<19x6xf32>
    tpu.vector_store %arg9[%c0_65, %c0_66], %82 {strides = array<i32>} : memref<19x6xf32, #tpu.memory_space<vmem>>, vector<19x6xf32>,
    %c0_67 = arith.constant 0 : index
    %c1_68 = arith.constant 1 : index
    %c0_69 = arith.constant 0 : index
    %84 = vector.load %arg8[%c0_67, %c1_68, %c0_69] : memref<4x25x6xbf16, #tpu.memory_space<vmem>>, vector<1x19x6xbf16>
    %85 = vector.shape_cast %84 : vector<1x19x6xbf16> to vector<19x6xbf16>
    %c2_70 = arith.constant 2 : index
    %c0_71 = arith.constant 0 : index
    %c0_72 = arith.constant 0 : index
    %86 = vector.load %arg5[%c2_70, %c0_71, %c0_72] : memref<9x6x6xbf16, #tpu.memory_space<vmem>>, vector<1x6x6xbf16>
    %87 = vector.shape_cast %86 : vector<1x6x6xbf16> to vector<6x6xbf16>
    %cst_73 = arith.constant dense<0.000000e+00> : vector<19x6xf32>
    %88 = tpu.matmul %85, %87, %cst_73 {dimension_numbers = #tpu.dot_dimension_numbers<[1], [0], [0], [1], [0, 0, 1, 1], [], []>} : vector<19x6xbf16>, vector<6x6xbf16>, vector<19x6xf32> -> vector<19x6xf32>
    %c0_74 = arith.constant 0 : index
    %c0_75 = arith.constant 0 : index
    %89 = vector.load %arg9[%c0_74, %c0_75] : memref<19x6xf32, #tpu.memory_space<vmem>>, vector<19x6xf32>
    %90 = arith.addf %89, %88 : vector<19x6xf32>
    %c0_76 = arith.constant 0 : index
    %c0_77 = arith.constant 0 : index
    %91 = vector.load %arg9[%c0_76, %c0_77] : memref<19x6xf32, #tpu.memory_space<vmem>>, vector<19x6xf32>
    tpu.vector_store %arg9[%c0_76, %c0_77], %90 {strides = array<i32>} : memref<19x6xf32, #tpu.memory_space<vmem>>, vector<19x6xf32>,
    %c2_78 = arith.constant 2 : index
    %c0_79 = arith.constant 0 : index
    %c0_80 = arith.constant 0 : index
    %92 = vector.load %arg8[%c2_78, %c0_79, %c0_80] : memref<4x25x6xbf16, #tpu.memory_space<vmem>>, vector<1x19x6xbf16>
    %93 = vector.shape_cast %92 : vector<1x19x6xbf16> to vector<19x6xbf16>
    %c3_81 = arith.constant 3 : index
    %c0_82 = arith.constant 0 : index
    %c0_83 = arith.constant 0 : index
    %94 = vector.load %arg5[%c3_81, %c0_82, %c0_83] : memref<9x6x6xbf16, #tpu.memory_space<vmem>>, vector<1x6x6xbf16>
    %95 = vector.shape_cast %94 : vector<1x6x6xbf16> to vector<6x6xbf16>
    %cst_84 = arith.constant dense<0.000000e+00> : vector<19x6xf32>
    %96 = tpu.matmul %93, %95, %cst_84 {dimension_numbers = #tpu.dot_dimension_numbers<[1], [0], [0], [1], [0, 0, 1, 1], [], []>} : vector<19x6xbf16>, vector<6x6xbf16>, vector<19x6xf32> -> vector<19x6xf32>
    %c0_85 = arith.constant 0 : index
    %c0_86 = arith.constant 0 : index
    %97 = vector.load %arg9[%c0_85, %c0_86] : memref<19x6xf32, #tpu.memory_space<vmem>>, vector<19x6xf32>
    %98 = arith.addf %97, %96 : vector<19x6xf32>
    %c0_87 = arith.constant 0 : index
    %c0_88 = arith.constant 0 : index
    %99 = vector.load %arg9[%c0_87, %c0_88] : memref<19x6xf32, #tpu.memory_space<vmem>>, vector<19x6xf32>
    tpu.vector_store %arg9[%c0_87, %c0_88], %98 {strides = array<i32>} : memref<19x6xf32, #tpu.memory_space<vmem>>, vector<19x6xf32>,
    %c3_89 = arith.constant 3 : index
    %c0_90 = arith.constant 0 : index
    %c0_91 = arith.constant 0 : index
    %100 = vector.load %arg8[%c3_89, %c0_90, %c0_91] : memref<4x25x6xbf16, #tpu.memory_space<vmem>>, vector<1x19x6xbf16>
    %101 = vector.shape_cast %100 : vector<1x19x6xbf16> to vector<19x6xbf16>
    %c4 = arith.constant 4 : index
    %c0_92 = arith.constant 0 : index
    %c0_93 = arith.constant 0 : index
    %102 = vector.load %arg5[%c4, %c0_92, %c0_93] : memref<9x6x6xbf16, #tpu.memory_space<vmem>>, vector<1x6x6xbf16>
    %103 = vector.shape_cast %102 : vector<1x6x6xbf16> to vector<6x6xbf16>
    %cst_94 = arith.constant dense<0.000000e+00> : vector<19x6xf32>
    %104 = tpu.matmul %101, %103, %cst_94 {dimension_numbers = #tpu.dot_dimension_numbers<[1], [0], [0], [1], [0, 0, 1, 1], [], []>} : vector<19x6xbf16>, vector<6x6xbf16>, vector<19x6xf32> -> vector<19x6xf32>
    %c0_95 = arith.constant 0 : index
    %c0_96 = arith.constant 0 : index
    %105 = vector.load %arg9[%c0_95, %c0_96] : memref<19x6xf32, #tpu.memory_space<vmem>>, vector<19x6xf32>
    %106 = arith.addf %105, %104 : vector<19x6xf32>
    %c0_97 = arith.constant 0 : index
    %c0_98 = arith.constant 0 : index
    %107 = vector.load %arg9[%c0_97, %c0_98] : memref<19x6xf32, #tpu.memory_space<vmem>>, vector<19x6xf32>
    tpu.vector_store %arg9[%c0_97, %c0_98], %106 {strides = array<i32>} : memref<19x6xf32, #tpu.memory_space<vmem>>, vector<19x6xf32>,
    %c2_99 = arith.constant 2 : index
    %c1_100 = arith.constant 1 : index
    %c0_101 = arith.constant 0 : index
    %108 = vector.load %arg8[%c2_99, %c1_100, %c0_101] : memref<4x25x6xbf16, #tpu.memory_space<vmem>>, vector<1x19x6xbf16>
    %109 = vector.shape_cast %108 : vector<1x19x6xbf16> to vector<19x6xbf16>
    %c5 = arith.constant 5 : index
    %c0_102 = arith.constant 0 : index
    %c0_103 = arith.constant 0 : index
    %110 = vector.load %arg5[%c5, %c0_102, %c0_103] : memref<9x6x6xbf16, #tpu.memory_space<vmem>>, vector<1x6x6xbf16>
    %111 = vector.shape_cast %110 : vector<1x6x6xbf16> to vector<6x6xbf16>
    %cst_104 = arith.constant dense<0.000000e+00> : vector<19x6xf32>
    %112 = tpu.matmul %109, %111, %cst_104 {dimension_numbers = #tpu.dot_dimension_numbers<[1], [0], [0], [1], [0, 0, 1, 1], [], []>} : vector<19x6xbf16>, vector<6x6xbf16>, vector<19x6xf32> -> vector<19x6xf32>
    %c0_105 = arith.constant 0 : index
    %c0_106 = arith.constant 0 : index
    %113 = vector.load %arg9[%c0_105, %c0_106] : memref<19x6xf32, #tpu.memory_space<vmem>>, vector<19x6xf32>
    %114 = arith.addf %113, %112 : vector<19x6xf32>
    %c0_107 = arith.constant 0 : index
    %c0_108 = arith.constant 0 : index
    %115 = vector.load %arg9[%c0_107, %c0_108] : memref<19x6xf32, #tpu.memory_space<vmem>>, vector<19x6xf32>
    tpu.vector_store %arg9[%c0_107, %c0_108], %114 {strides = array<i32>} : memref<19x6xf32, #tpu.memory_space<vmem>>, vector<19x6xf32>,
    %c0_109 = arith.constant 0 : index
    %c5_110 = arith.constant 5 : index
    %c0_111 = arith.constant 0 : index
    %116 = vector.load %arg8[%c0_109, %c5_110, %c0_111] : memref<4x25x6xbf16, #tpu.memory_space<vmem>>, vector<1x19x6xbf16>
    %117 = vector.shape_cast %116 : vector<1x19x6xbf16> to vector<19x6xbf16>
    %c6 = arith.constant 6 : index
    %c0_112 = arith.constant 0 : index
    %c0_113 = arith.constant 0 : index
    %118 = vector.load %arg5[%c6, %c0_112, %c0_113] : memref<9x6x6xbf16, #tpu.memory_space<vmem>>, vector<1x6x6xbf16>
    %119 = vector.shape_cast %118 : vector<1x6x6xbf16> to vector<6x6xbf16>
    %cst_114 = arith.constant dense<0.000000e+00> : vector<19x6xf32>
    %120 = tpu.matmul %117, %119, %cst_114 {dimension_numbers = #tpu.dot_dimension_numbers<[1], [0], [0], [1], [0, 0, 1, 1], [], []>} : vector<19x6xbf16>, vector<6x6xbf16>, vector<19x6xf32> -> vector<19x6xf32>
    %c0_115 = arith.constant 0 : index
    %c0_116 = arith.constant 0 : index
    %121 = vector.load %arg9[%c0_115, %c0_116] : memref<19x6xf32, #tpu.memory_space<vmem>>, vector<19x6xf32>
    %122 = arith.addf %121, %120 : vector<19x6xf32>
    %c0_117 = arith.constant 0 : index
    %c0_118 = arith.constant 0 : index
    %123 = vector.load %arg9[%c0_117, %c0_118] : memref<19x6xf32, #tpu.memory_space<vmem>>, vector<19x6xf32>
    tpu.vector_store %arg9[%c0_117, %c0_118], %122 {strides = array<i32>} : memref<19x6xf32, #tpu.memory_space<vmem>>, vector<19x6xf32>,
    %c1_119 = arith.constant 1 : index
    %c5_120 = arith.constant 5 : index
    %c0_121 = arith.constant 0 : index
    %124 = vector.load %arg8[%c1_119, %c5_120, %c0_121] : memref<4x25x6xbf16, #tpu.memory_space<vmem>>, vector<1x19x6xbf16>
    %125 = vector.shape_cast %124 : vector<1x19x6xbf16> to vector<19x6xbf16>
    %c7 = arith.constant 7 : index
    %c0_122 = arith.constant 0 : index
    %c0_123 = arith.constant 0 : index
    %126 = vector.load %arg5[%c7, %c0_122, %c0_123] : memref<9x6x6xbf16, #tpu.memory_space<vmem>>, vector<1x6x6xbf16>
    %127 = vector.shape_cast %126 : vector<1x6x6xbf16> to vector<6x6xbf16>
    %cst_124 = arith.constant dense<0.000000e+00> : vector<19x6xf32>
    %128 = tpu.matmul %125, %127, %cst_124 {dimension_numbers = #tpu.dot_dimension_numbers<[1], [0], [0], [1], [0, 0, 1, 1], [], []>} : vector<19x6xbf16>, vector<6x6xbf16>, vector<19x6xf32> -> vector<19x6xf32>
    %c0_125 = arith.constant 0 : index
    %c0_126 = arith.constant 0 : index
    %129 = vector.load %arg9[%c0_125, %c0_126] : memref<19x6xf32, #tpu.memory_space<vmem>>, vector<19x6xf32>
    %130 = arith.addf %129, %128 : vector<19x6xf32>
    %c0_127 = arith.constant 0 : index
    %c0_128 = arith.constant 0 : index
    %131 = vector.load %arg9[%c0_127, %c0_128] : memref<19x6xf32, #tpu.memory_space<vmem>>, vector<19x6xf32>
    tpu.vector_store %arg9[%c0_127, %c0_128], %130 {strides = array<i32>} : memref<19x6xf32, #tpu.memory_space<vmem>>, vector<19x6xf32>,
    %c0_129 = arith.constant 0 : index
    %c6_130 = arith.constant 6 : index
    %c0_131 = arith.constant 0 : index
    %132 = vector.load %arg8[%c0_129, %c6_130, %c0_131] : memref<4x25x6xbf16, #tpu.memory_space<vmem>>, vector<1x19x6xbf16>
    %133 = vector.shape_cast %132 : vector<1x19x6xbf16> to vector<19x6xbf16>
    %c8 = arith.constant 8 : index
    %c0_132 = arith.constant 0 : index
    %c0_133 = arith.constant 0 : index
    %134 = vector.load %arg5[%c8, %c0_132, %c0_133] : memref<9x6x6xbf16, #tpu.memory_space<vmem>>, vector<1x6x6xbf16>
    %135 = vector.shape_cast %134 : vector<1x6x6xbf16> to vector<6x6xbf16>
    %cst_134 = arith.constant dense<0.000000e+00> : vector<19x6xf32>
    %136 = tpu.matmul %133, %135, %cst_134 {dimension_numbers = #tpu.dot_dimension_numbers<[1], [0], [0], [1], [0, 0, 1, 1], [], []>} : vector<19x6xbf16>, vector<6x6xbf16>, vector<19x6xf32> -> vector<19x6xf32>
    %c0_135 = arith.constant 0 : index
    %c0_136 = arith.constant 0 : index
    %137 = vector.load %arg9[%c0_135, %c0_136] : memref<19x6xf32, #tpu.memory_space<vmem>>, vector<19x6xf32>
    %138 = arith.addf %137, %136 : vector<19x6xf32>
    %c0_137 = arith.constant 0 : index
    %c0_138 = arith.constant 0 : index
    %139 = vector.load %arg9[%c0_137, %c0_138] : memref<19x6xf32, #tpu.memory_space<vmem>>, vector<19x6xf32>
    tpu.vector_store %arg9[%c0_137, %c0_138], %138 {strides = array<i32>} : memref<19x6xf32, #tpu.memory_space<vmem>>, vector<19x6xf32>,
    %c0_139 = arith.constant 0 : index
    %c0_140 = arith.constant 0 : index
    %140 = vector.load %arg9[%c0_139, %c0_140] : memref<19x6xf32, #tpu.memory_space<vmem>>, vector<19x6xf32>
    %141 = tpu.iota {dimensions = array<i32: 0>} : vector<19x1xi32>
    %c5_i32 = arith.constant 5 : i32
    %c0_i32 = arith.constant 0 : i32
    %142 = arith.cmpi eq, %c5_i32, %c0_i32 : i32
    %c1_i32 = arith.constant 1 : i32
    %143 = arith.select %142, %c1_i32, %c5_i32 : i32
    %144 = vector.broadcast %143 : i32 to vector<19x1xi32>
    %145 = arith.remsi %141, %144 : vector<19x1xi32>
    %c0_i32_141 = arith.constant 0 : i32
    %146 = vector.broadcast %c0_i32_141 : i32 to vector<19x1xi32>
    %147 = arith.cmpi ne, %145, %146 : vector<19x1xi32>
    %c0_i32_142 = arith.constant 0 : i32
    %148 = vector.broadcast %c0_i32_142 : i32 to vector<19x1xi32>
    %149 = arith.cmpi slt, %145, %148 : vector<19x1xi32>
    %c0_i32_143 = arith.constant 0 : i32
    %150 = arith.cmpi slt, %143, %c0_i32_143 : i32
    %151 = vector.broadcast %150 : i1 to vector<19x1xi1>
    %152 = vector.broadcast %151 : vector<19x1xi1> to vector<19x1xi1>
    %153 = arith.xori %149, %152 : vector<19x1xi1>
    %154 = arith.andi %153, %147 : vector<19x1xi1>
    %155 = vector.broadcast %143 : i32 to vector<19x1xi32>
    %156 = arith.addi %145, %155 : vector<19x1xi32>
    %157 = arith.select %154, %156, %145 : vector<19x1xi1>, vector<19x1xi32>
    %c4_i32 = arith.constant 4 : i32
    %158 = vector.broadcast %c4_i32 : i32 to vector<19x1xi32>
    %159 = arith.cmpi slt, %157, %158 : vector<19x1xi32>
    %160 = arith.extui %159 : vector<19x1xi1> to vector<19x1xi32>
    %161 = arith.sitofp %160 : vector<19x1xi32> to vector<19x1xf32>
    %162 = vector.broadcast %161 : vector<19x1xf32> to vector<19x6xf32>
    %163 = arith.mulf %140, %162 : vector<19x6xf32>
    %cst_144 = arith.constant dense<0.000000e+00> : vector<6xf32>
    %164 = vector.multi_reduction <add>, %163, %cst_144 [0] : vector<19x6xf32> to vector<6xf32>
    %165 = vector.shape_cast %164 : vector<6xf32> to vector<1x6xf32>
    %c0_145 = arith.constant 0 : index
    %c0_146 = arith.constant 0 : index
    %166 = vector.load %arg7[%c0_145, %c0_146] : memref<8x6xf32, #tpu.memory_space<vmem>>, vector<1x6xf32>
    tpu.vector_store %arg7[%c0_145, %c0_146], %165 {strides = array<i32>} : memref<8x6xf32, #tpu.memory_space<vmem>>, vector<1x6xf32>,
    %167 = arith.mulf %163, %163 : vector<19x6xf32>
    %cst_147 = arith.constant dense<0.000000e+00> : vector<6xf32>
    %168 = vector.multi_reduction <add>, %167, %cst_147 [0] : vector<19x6xf32> to vector<6xf32>
    %169 = vector.shape_cast %168 : vector<6xf32> to vector<1x6xf32>
    %c1_148 = arith.constant 1 : index
    %c0_149 = arith.constant 0 : index
    %170 = vector.load %arg7[%c1_148, %c0_149] : memref<8x6xf32, #tpu.memory_space<vmem>>, vector<1x6xf32>
    tpu.vector_store %arg7[%c1_148, %c0_149], %169 {strides = array<i32>} : memref<8x6xf32, #tpu.memory_space<vmem>>, vector<1x6xf32>,
    %c0_150 = arith.constant 0 : index
    %c0_151 = arith.constant 0 : index
    %171 = vector.load %arg9[%c0_150, %c0_151] : memref<19x6xf32, #tpu.memory_space<vmem>>, vector<4x6xf32>
    %172 = arith.truncf %171 : vector<4x6xf32> to vector<4x6xbf16>
    %c0_152 = arith.constant 0 : index
    %c0_153 = arith.constant 0 : index
    %c0_154 = arith.constant 0 : index
    %c0_155 = arith.constant 0 : index
    %173 = vector.load %arg6[%c0_152, %c0_153, %c0_154, %c0_155] : memref<1x4x4x6xbf16, #tpu.memory_space<vmem>>, vector<1x1x4x6xbf16>
    %174 = vector.shape_cast %173 : vector<1x1x4x6xbf16> to vector<4x6xbf16>
    %175 = vector.shape_cast %172 : vector<4x6xbf16> to vector<1x1x4x6xbf16>
    tpu.vector_store %arg6[%c0_152, %c0_153, %c0_154, %c0_155], %175 {strides = array<i32>} : memref<1x4x4x6xbf16, #tpu.memory_space<vmem>>, vector<1x1x4x6xbf16>,
    %c5_156 = arith.constant 5 : index
    %c0_157 = arith.constant 0 : index
    %176 = vector.load %arg9[%c5_156, %c0_157] : memref<19x6xf32, #tpu.memory_space<vmem>>, vector<4x6xf32>
    %177 = arith.truncf %176 : vector<4x6xf32> to vector<4x6xbf16>
    %c0_158 = arith.constant 0 : index
    %c1_159 = arith.constant 1 : index
    %c0_160 = arith.constant 0 : index
    %c0_161 = arith.constant 0 : index
    %178 = vector.load %arg6[%c0_158, %c1_159, %c0_160, %c0_161] : memref<1x4x4x6xbf16, #tpu.memory_space<vmem>>, vector<1x1x4x6xbf16>
    %179 = vector.shape_cast %178 : vector<1x1x4x6xbf16> to vector<4x6xbf16>
    %180 = vector.shape_cast %177 : vector<4x6xbf16> to vector<1x1x4x6xbf16>
    tpu.vector_store %arg6[%c0_158, %c1_159, %c0_160, %c0_161], %180 {strides = array<i32>} : memref<1x4x4x6xbf16, #tpu.memory_space<vmem>>, vector<1x1x4x6xbf16>,
    %c10 = arith.constant 10 : index
    %c0_162 = arith.constant 0 : index
    %181 = vector.load %arg9[%c10, %c0_162] : memref<19x6xf32, #tpu.memory_space<vmem>>, vector<4x6xf32>
    %182 = arith.truncf %181 : vector<4x6xf32> to vector<4x6xbf16>
    %c0_163 = arith.constant 0 : index
    %c2_164 = arith.constant 2 : index
    %c0_165 = arith.constant 0 : index
    %c0_166 = arith.constant 0 : index
    %183 = vector.load %arg6[%c0_163, %c2_164, %c0_165, %c0_166] : memref<1x4x4x6xbf16, #tpu.memory_space<vmem>>, vector<1x1x4x6xbf16>
    %184 = vector.shape_cast %183 : vector<1x1x4x6xbf16> to vector<4x6xbf16>
    %185 = vector.shape_cast %182 : vector<4x6xbf16> to vector<1x1x4x6xbf16>
    tpu.vector_store %arg6[%c0_163, %c2_164, %c0_165, %c0_166], %185 {strides = array<i32>} : memref<1x4x4x6xbf16, #tpu.memory_space<vmem>>, vector<1x1x4x6xbf16>,
    %c15 = arith.constant 15 : index
    %c0_167 = arith.constant 0 : index
    %186 = vector.load %arg9[%c15, %c0_167] : memref<19x6xf32, #tpu.memory_space<vmem>>, vector<4x6xf32>
    %187 = arith.truncf %186 : vector<4x6xf32> to vector<4x6xbf16>
    %c0_168 = arith.constant 0 : index
    %c3_169 = arith.constant 3 : index
    %c0_170 = arith.constant 0 : index
    %c0_171 = arith.constant 0 : index
    %188 = vector.load %arg6[%c0_168, %c3_169, %c0_170, %c0_171] : memref<1x4x4x6xbf16, #tpu.memory_space<vmem>>, vector<1x1x4x6xbf16>
    %189 = vector.shape_cast %188 : vector<1x1x4x6xbf16> to vector<4x6xbf16>
    %190 = vector.shape_cast %187 : vector<4x6xbf16> to vector<1x1x4x6xbf16>
    tpu.vector_store %arg6[%c0_168, %c3_169, %c0_170, %c0_171], %190 {strides = array<i32>} : memref<1x4x4x6xbf16, #tpu.memory_space<vmem>>, vector<1x1x4x6xbf16>,
    return
  }
  func.func @transform_0(%arg0: i32) -> (i32, i32, i32, i32) {
    %c0_i32 = arith.constant 0 : i32
    %c0_i32_0 = arith.constant 0 : i32
    %c0_i32_1 = arith.constant 0 : i32
    %c0_i32_2 = arith.constant 0 : i32
    return %c0_i32, %arg0, %c0_i32_0, %c0_i32_1 : i32, i32, i32, i32
  }
  func.func @transform_1(%arg0: i32) -> (i32, i32, i32, i32) {
    %c0_i32 = arith.constant 0 : i32
    %c0_i32_0 = arith.constant 0 : i32
    %c0_i32_1 = arith.constant 0 : i32
    %c0_i32_2 = arith.constant 0 : i32
    %c0_i32_3 = arith.constant 0 : i32
    return %c0_i32, %c0_i32_0, %c0_i32_1, %c0_i32_2 : i32, i32, i32, i32
  }
  func.func @transform_2(%arg0: i32) -> (i32, i32) {
    %c0_i32 = arith.constant 0 : i32
    %c0_i32_0 = arith.constant 0 : i32
    %c0_i32_1 = arith.constant 0 : i32
    return %c0_i32, %c0_i32_0 : i32, i32
  }
  func.func @transform_3(%arg0: i32) -> (i32, i32) {
    %c0_i32 = arith.constant 0 : i32
    %c0_i32_0 = arith.constant 0 : i32
    %c0_i32_1 = arith.constant 0 : i32
    return %c0_i32, %c0_i32_0 : i32, i32
  }
  func.func @transform_4(%arg0: i32) -> (i32, i32, i32) {
    %c0_i32 = arith.constant 0 : i32
    %c0_i32_0 = arith.constant 0 : i32
    %c0_i32_1 = arith.constant 0 : i32
    %c0_i32_2 = arith.constant 0 : i32
    return %c0_i32, %c0_i32_0, %c0_i32_1 : i32, i32, i32
  }
  func.func @transform_5(%arg0: i32) -> (i32, i32, i32, i32) {
    %c0_i32 = arith.constant 0 : i32
    %c0_i32_0 = arith.constant 0 : i32
    %c0_i32_1 = arith.constant 0 : i32
    %c0_i32_2 = arith.constant 0 : i32
    return %arg0, %c0_i32, %c0_i32_0, %c0_i32_1 : i32, i32, i32, i32
  }
  func.func @transform_6(%arg0: i32) -> (i32, i32) {
    %c0_i32 = arith.constant 0 : i32
    %c0_i32_0 = arith.constant 0 : i32
    return %arg0, %c0_i32 : i32, i32
  }
}

module attributes {stable_mosaic.version = 11 : i64} {
  func.func @_bn_add_bn_relu_kernel(%arg0: i32, %arg1: memref<16x32xbf16, #tpu.memory_space<vmem>>, %arg2: memref<1x32xf32, #tpu.memory_space<vmem>>, %arg3: memref<1x32xf32, #tpu.memory_space<vmem>>, %arg4: memref<16x32xbf16, #tpu.memory_space<vmem>>, %arg5: memref<1x32xf32, #tpu.memory_space<vmem>>, %arg6: memref<1x32xf32, #tpu.memory_space<vmem>>, %arg7: memref<16x32xf32, #tpu.memory_space<vmem>>) attributes {dimension_semantics = [#tpu.dimension_semantics<parallel>], iteration_bounds = array<i64: 2>, scalar_prefetch = 0 : i64, scratch_operands = 0 : i64, tpu.core_type = #tpu.core_type<tc>, window_params = [{transform_indices = @transform_0, window_bounds = array<i64: 16, 32>}, {pipeline_mode = #tpu.pipeline_mode<synchronous>, transform_indices = @transform_1, window_bounds = array<i64: 1, 32>}, {pipeline_mode = #tpu.pipeline_mode<synchronous>, transform_indices = @transform_2, window_bounds = array<i64: 1, 32>}, {transform_indices = @transform_3, window_bounds = array<i64: 16, 32>}, {pipeline_mode = #tpu.pipeline_mode<synchronous>, transform_indices = @transform_4, window_bounds = array<i64: 1, 32>}, {pipeline_mode = #tpu.pipeline_mode<synchronous>, transform_indices = @transform_5, window_bounds = array<i64: 1, 32>}, {transform_indices = @transform_6, window_bounds = array<i64: 16, 32>}]} {
    %c0 = arith.constant 0 : index
    %c0_0 = arith.constant 0 : index
    %0 = vector.load %arg1[%c0, %c0_0] : memref<16x32xbf16, #tpu.memory_space<vmem>>, vector<16x32xbf16>
    %1 = arith.extf %0 : vector<16x32xbf16> to vector<16x32xf32>
    %c0_1 = arith.constant 0 : index
    %c0_2 = arith.constant 0 : index
    %2 = vector.load %arg2[%c0_1, %c0_2] : memref<1x32xf32, #tpu.memory_space<vmem>>, vector<1x32xf32>
    %3 = vector.broadcast %2 : vector<1x32xf32> to vector<16x32xf32>
    %4 = arith.mulf %1, %3 : vector<16x32xf32>
    %c0_3 = arith.constant 0 : index
    %c0_4 = arith.constant 0 : index
    %5 = vector.load %arg3[%c0_3, %c0_4] : memref<1x32xf32, #tpu.memory_space<vmem>>, vector<1x32xf32>
    %6 = vector.broadcast %5 : vector<1x32xf32> to vector<16x32xf32>
    %7 = arith.addf %4, %6 : vector<16x32xf32>
    %c0_5 = arith.constant 0 : index
    %c0_6 = arith.constant 0 : index
    %8 = vector.load %arg4[%c0_5, %c0_6] : memref<16x32xbf16, #tpu.memory_space<vmem>>, vector<16x32xbf16>
    %9 = arith.extf %8 : vector<16x32xbf16> to vector<16x32xf32>
    %c0_7 = arith.constant 0 : index
    %c0_8 = arith.constant 0 : index
    %10 = vector.load %arg5[%c0_7, %c0_8] : memref<1x32xf32, #tpu.memory_space<vmem>>, vector<1x32xf32>
    %11 = vector.broadcast %10 : vector<1x32xf32> to vector<16x32xf32>
    %12 = arith.mulf %9, %11 : vector<16x32xf32>
    %13 = arith.addf %7, %12 : vector<16x32xf32>
    %c0_9 = arith.constant 0 : index
    %c0_10 = arith.constant 0 : index
    %14 = vector.load %arg6[%c0_9, %c0_10] : memref<1x32xf32, #tpu.memory_space<vmem>>, vector<1x32xf32>
    %15 = vector.broadcast %14 : vector<1x32xf32> to vector<16x32xf32>
    %16 = arith.addf %13, %15 : vector<16x32xf32>
    %cst = arith.constant 0.000000e+00 : f32
    %17 = vector.broadcast %cst : f32 to vector<16x32xf32>
    %18 = arith.maximumf %16, %17 : vector<16x32xf32>
    %c0_11 = arith.constant 0 : index
    %c0_12 = arith.constant 0 : index
    %19 = vector.load %arg7[%c0_11, %c0_12] : memref<16x32xf32, #tpu.memory_space<vmem>>, vector<16x32xf32>
    tpu.vector_store %arg7[%c0_11, %c0_12], %18 {strides = array<i32>} : memref<16x32xf32, #tpu.memory_space<vmem>>, vector<16x32xf32>,
    return
  }
  func.func @transform_0(%arg0: i32) -> (i32, i32) {
    %c0_i32 = arith.constant 0 : i32
    %c0_i32_0 = arith.constant 0 : i32
    return %arg0, %c0_i32 : i32, i32
  }
  func.func @transform_1(%arg0: i32) -> (i32, i32) {
    %c0_i32 = arith.constant 0 : i32
    %c0_i32_0 = arith.constant 0 : i32
    %c0_i32_1 = arith.constant 0 : i32
    return %c0_i32, %c0_i32_0 : i32, i32
  }
  func.func @transform_2(%arg0: i32) -> (i32, i32) {
    %c0_i32 = arith.constant 0 : i32
    %c0_i32_0 = arith.constant 0 : i32
    %c0_i32_1 = arith.constant 0 : i32
    return %c0_i32, %c0_i32_0 : i32, i32
  }
  func.func @transform_3(%arg0: i32) -> (i32, i32) {
    %c0_i32 = arith.constant 0 : i32
    %c0_i32_0 = arith.constant 0 : i32
    return %arg0, %c0_i32 : i32, i32
  }
  func.func @transform_4(%arg0: i32) -> (i32, i32) {
    %c0_i32 = arith.constant 0 : i32
    %c0_i32_0 = arith.constant 0 : i32
    %c0_i32_1 = arith.constant 0 : i32
    return %c0_i32, %c0_i32_0 : i32, i32
  }
  func.func @transform_5(%arg0: i32) -> (i32, i32) {
    %c0_i32 = arith.constant 0 : i32
    %c0_i32_0 = arith.constant 0 : i32
    %c0_i32_1 = arith.constant 0 : i32
    return %c0_i32, %c0_i32_0 : i32, i32
  }
  func.func @transform_6(%arg0: i32) -> (i32, i32) {
    %c0_i32 = arith.constant 0 : i32
    %c0_i32_0 = arith.constant 0 : i32
    return %arg0, %c0_i32 : i32, i32
  }
}

</mosaic_0001>

<bundles_post_ra>
// kernel: bottleneck_forward.8
= control target key start
LH: loop header
LB: loop body
LE: loop exit
PB: predicated region body
PF: predicated region fallthrough
CT: control target
= control target key end

     0   :  { %s437_s12 = smov 0   ;;  %s465_s0 = inlined_call_operand.vmem [shape: bf16[32,16], index: 0, kind: input, shape index: {}]   ;;  %s466_s1 = inlined_call_operand.vmem [shape: bf16[16,32], index: 1, kind: input, shape index: {}]   ;;  %s467_s2 = inlined_call_operand.vmem [shape: bf16[32,32], index: 2, kind: output, shape index: {0}]   ;;  %s468_s3 = inlined_call_operand.vmem [shape: f32[16,32], index: 3, kind: output, shape index: {1}]  }
   0x1 LB: > { %s443_s13 = sadd.s32 4294967295, %s413_s12   ;;  %p372_p0 = scmp.ge.s32.totalorder %s413_s12, 1  ;;  %s413_s12 = sphi %s437_s12, %s14_s12  }
   0x2   : > { %p141_p1 = scmp.lt.s32.totalorder %s413_s12, 3 }
   0x4   : > { %p142_p2 = pnand %p372_p0, %p141_p1 }
   0x5   : > { %v405_v0 = vld [vmem:[%s466_s1] sm:$0xff] (!%p142_p2)   ;;  %v415_v1 = vmov (!%p142_p2), 0.0   ;;  %s373_s16 = sshll.u32 (!%p142_p2), %s443_s13, 1  ;;  %vm416_vm0 = vmmov (!%p142_p2), 0   ;;  %vm201_vm1 = vcmask (!%p142_p2), 130048   ;;  %vm254_vm2 = vcmask (!%p142_p2), 257024  }
   0x6   : > { %145 = sbr.rel (%p142_p2) target bundleno = 249 (0xf9), region = 28  ;;  %389 = vmatprep.subr.bf16.mxu0 (!%p142_p2), %v415_v1  ;;  %391 = vmatprep.mubr.msk.bf16.mxu0 (!%p142_p2), %vm416_vm0, %v415_v1  ;;  %p170_p3 = scmp.lt.s32.totalorder (!%p142_p2), %s373_s16, 3  ;;  %vm257_vm3 = vcmask (!%p142_p2), 261120   ;;  %vm267_vm4 = vcmask (!%p142_p2), 253952  }
   0x7   : > { %390 = vmatpush3.bf16.msra.mxu0 (!%p142_p2), %v405_v0  ;;  %p181_p4 = scmp.lt.s32.totalorder (!%p142_p2), %s443_s13, 1 }
   0xd   : > { %s470_s16 = smov (!%p170_p3, %s373_s16), 3  ;;  %s472_s13 = smov (!%p181_p4, %s443_s13), 1 }
   0xe   : > { %s374_s17 = sshll.u32 %s470_s16, 2  ;;  %s377_s24 = sshll.u32 %s472_s13, 3 }
   0xf   : > { %s173_s20 = scalar_lea.vmem %s465_s0, %s374_s17  ;;  %s179_s23 = scalar_lea.vmem %s467_s2, %s374_s17 }
  0x10   : > { %v406_v2 = vld [vmem:[%s173_s20] sm:$0xff]   ;;  %s184_s27 = scalar_lea.vmem %s468_s3, %s377_s24 }
  0x11   : > { %392 = vmatmul.mubr.msk.bf16.vlgmr.msra.gmra.mrb[0].mxu0 %vm201_vm1, %v406_v2 }
  0xe4   : > { %v239_v3 = vpop.f32.mrb[0].mxu0 }
  0xe5   : > { %v385_v4 = vpack.c.bf16 %v239_v3, %v239_v3  ;;  %v269_v5 = vmul.f32 %v239_v3, %v239_v3  ;;  %v393_v6 = vpop.f32.mrb[1].mxu0  ;;  %v258_v8 = vsel %vm257_vm3, %v239_v3, 0.0 }
  0xe6   : > { %v242_v7 = vpop.f32.mrb[2].mxu0 }
  0xe7   : > { %255 = vst.msk [vmem:[%s179_s23] sm:$0xf] %vm254_vm2, %v385_v4  ;;  %v386_v9 = vpack.c.bf16 %v242_v7, %v242_v7  ;;  %v259_v10 = vsel %vm257_vm3, %v242_v7, 0.0  ;;  %v270_v11 = vmul.f32 %v242_v7, %v242_v7  ;;  %v394_v12 = vpop.f32.mrb[3].mxu0  ;;  %v271_v14 = vsel %vm257_vm3, %v269_v5, 0.0 }
  0xe8   : > { %v260_v13 = vadd.f32 %v259_v10, %v258_v8 }
  0xe9   : > { %256 = vst.msk [vmem:[%s179_s23 + $0x4] sm:$0xf] %vm254_vm2, %v386_v9  ;;  %v272_v15 = vsel %vm257_vm3, %v270_v11, 0.0 }
  0xea   : > { %v261_v16 = vrot.slane %v260_v13, 4  ;;  %v273_v17 = vadd.f32 %v272_v15, %v271_v14 }
  0xec   : > { %v262_v18 = vadd.f32 %v261_v16, %v260_v13  ;;  %v274_v19 = vrot.slane %v273_v17, 4 }
  0xee   : > { %v263_v20 = vrot.slane %v262_v18, 2  ;;  %v275_v21 = vadd.f32 %v274_v19, %v273_v17 }
  0xf0   : > { %v264_v22 = vadd.f32 %v263_v20, %v262_v18  ;;  %v276_v23 = vrot.slane %v275_v21, 2 }
  0xf2   : > { %v265_v24 = vrot.slane %v264_v22, 1  ;;  %v277_v25 = vadd.f32 %v276_v23, %v275_v21 }
  0xf4   : > { %v266_v26 = vadd.f32 %v265_v24, %v264_v22  ;;  %v278_v27 = vrot.slane %v277_v25, 1 }
  0xf6   : > { %268 = vst.msk [vmem:[%s184_s27] sm:$0x1] %vm267_vm4, %v266_v26  ;;  %v279_v28 = vadd.f32 %v278_v27, %v277_v25 }
  0xf8   : > { %280 = vst.msk [vmem:[%s184_s27 + $0x1] sm:$0x1] %vm267_vm4, %v279_v28 }
  0xf9 PF: > { %s14_s12 = sadd.s32 1, %s413_s12  }
  0xfa   : > { %p11_p5 = scmp.ge.s32.totalorder %s14_s12, 4  }
  0xfc   :  { %13 = sbr.rel (!%p11_p5) target bundleno = 1 (0x1), region = 70 }

// kernel: bottleneck_forward.5
= control target key start
LH: loop header
LB: loop body
LE: loop exit
PB: predicated region body
PF: predicated region fallthrough
CT: control target
= control target key end

     0   :  { %s577_s12 = smov 0   ;;  %s639_s0 = inlined_call_operand.vmem [shape: bf16[128,16], index: 0, kind: input, shape index: {}]   ;;  %s640_s1 = inlined_call_operand.vmem [shape: bf16[16,6], index: 1, kind: input, shape index: {}]   ;;  %s641_s2 = inlined_call_operand.vmem [shape: bf16[128,6], index: 2, kind: output, shape index: {0}]   ;;  %s642_s3 = inlined_call_operand.vmem [shape: f32[16,6], index: 3, kind: output, shape index: {1}]  }
   0x1 LB: > { %s583_s13 = sadd.s32 4294967295, %s555_s12   ;;  %p486_p0 = scmp.ge.s32.totalorder %s555_s12, 1  ;;  %s555_s12 = sphi %s577_s12, %s14_s12  }
   0x2   : > { %p141_p1 = scmp.lt.s32.totalorder %s555_s12, 3 }
   0x4   : > { %p142_p2 = pnand %p486_p0, %p141_p1 }
   0x5   : > { %v544_v0 = vld [vmem:[%s640_s1] sm:$0xff] (!%p142_p2)   ;;  %s487_s16 = sshll.u32 (!%p142_p2), %s583_s13, 3  ;;  %vm222_vm0 = vcmask (!%p142_p2), 130048   ;;  %vm332_vm1 = vcmask (!%p142_p2), 44032   ;;  %vm341_vm2 = vcmask (!%p142_p2), 48128   ;;  %p181_p4 = scmp.lt.s32.totalorder (!%p142_p2), %s583_s13, 1 }
   0x6   : > { %145 = sbr.rel (%p142_p2) target bundleno = 263 (0x107), region = 28  ;;  %p170_p3 = scmp.lt.s32.totalorder (!%p142_p2), %s487_s16, 15  ;;  %524 = vmatprep.subr.bf16.mxu0 (!%p142_p2), %v544_v0  ;;  %534 = vmatprep.subr.bf16.mxu1 (!%p142_p2), %v544_v0  ;;  %vm363_vm3 = vcmask (!%p142_p2), 40960  }
   0x7   : > { %525 = vmatpush3.bf16.msra.mxu0 (!%p142_p2), %v544_v0  ;;  %535 = vmatpush3.bf16.msra.mxu1 (!%p142_p2), %v544_v0 }
   0xd   : > { %s644_s16 = smov (!%p170_p3, %s487_s16), 15  ;;  %s646_s13 = smov (!%p181_p4, %s583_s13), 1 }
   0xe   : > { %s488_s17 = sshll.u32 %s644_s16, 2  ;;  %s491_s24 = sshll.u32 %s646_s13, 3 }
   0xf   : > { %s173_s20 = scalar_lea.vmem %s639_s0, %s488_s17  ;;  %s597_s23 = scalar_lea.vmem %s641_s2, %s488_s17 }
  0x10   : > { %v545_v1 = vld [vmem:[%s173_s20] sm:$0xff]   ;;  %v546_v2 = vld [vmem:[%s173_s20 + $0x8] sm:$0xff]   ;;  %v547_v3 = vld [vmem:[%s173_s20 + $0x10] sm:$0xff]   ;;  %s184_s27 = scalar_lea.vmem %s642_s3, %s491_s24 }
  0x11   : > { %526 = vmatprep.mubr.msk.bf16.mxu0 %vm222_vm0, %v545_v1  ;;  %v548_v4 = vld [vmem:[%s173_s20 + $0x18] sm:$0xff]   ;;  %530 = vmatprep.mubr.msk.bf16.mxu1 %vm222_vm0, %v547_v3 }
  0x12   : > { %527 = vmatmul.mubr.msk.bf16.vlgmr.msra.gmra.mrb[0].mxu0 %vm222_vm0, %v546_v2  ;;  %531 = vmatmul.mubr.msk.bf16.vlgmr.msra.gmra.mrb[0].mxu1 %vm222_vm0, %v548_v4 }
  0xe5   : > { %v528_v5 = vpop.f32.mrb[0].mxu0  ;;  %v532_v11 = vpop.f32.mrb[0].mxu1 }
  0xe6   : > { %v513_v6 = vpack.c.bf16 %v528_v5, %v528_v5  ;;  %v269_v7 = vpop.f32.mrb[1].mxu0  ;;  %v367_v12 = vmul.f32 %v528_v5, %v528_v5  ;;  %v285_v15 = vpop.f32.mrb[1].mxu1  ;;  %v345_v21 = vsel %vm341_vm2, %v528_v5, 0.0  ;;  %v517_v23 = vpack.c.bf16 %v532_v11, %v532_v11 }
  0xe7   : > { %v511_v8 = vpack.c.bf16 %v269_v7, %v269_v7  ;;  %v365_v9 = vmul.f32 %v269_v7, %v269_v7  ;;  %v529_v10 = vpop.f32.mrb[2].mxu0  ;;  %v342_v16 = vsel %vm341_vm2, %v269_v7, 0.0  ;;  %v533_v20 = vpop.f32.mrb[2].mxu1  ;;  %v515_v28 = vpack.c.bf16 %v285_v15, %v285_v15 }
  0xe8   : > { %335 = vst.msk [vmem:[%s597_s23 + $0x8] sm:$0xf] %vm332_vm1, %v513_v6  ;;  %v514_v13 = vpack.c.bf16 %v529_v10, %v529_v10  ;;  %v272_v14 = vpop.f32.mrb[3].mxu0  ;;  %v288_v24 = vpop.f32.mrb[3].mxu1  ;;  %v368_v26 = vmul.f32 %v529_v10, %v529_v10  ;;  %339 = vst.msk [vmem:[%s597_s23 + $0x18] sm:$0xf] %vm332_vm1, %v517_v23  ;;  %v369_v31 = vmul.f32 %v285_v15, %v285_v15 }
  0xe9   : > { %333 = vst.msk [vmem:[%s597_s23] sm:$0xf] %vm332_vm1, %v511_v8  ;;  %v512_v17 = vpack.c.bf16 %v272_v14, %v272_v14  ;;  %v343_v18 = vsel %vm341_vm2, %v272_v14, 0.0  ;;  %v366_v19 = vmul.f32 %v272_v14, %v272_v14  ;;  %v373_v25 = vsel %vm341_vm2, %v365_v9, 0.0  ;;  %337 = vst.msk [vmem:[%s597_s23 + $0x10] sm:$0xf] %vm332_vm1, %v515_v28 }
  0xea   : > { %336 = vst.msk [vmem:[%s597_s23 + $0xc] sm:$0xf] %vm332_vm1, %v514_v13  ;;  %v344_v22 = vadd.f32 %v343_v18, %v342_v16  ;;  %v518_v32 = vpack.c.bf16 %v533_v20, %v533_v20  ;;  %v376_v33 = vsel %vm341_vm2, %v367_v12, 0.0  ;;  %v347_v34 = vsel %vm341_vm2, %v529_v10, 0.0 }
  0xeb   : > { %334 = vst.msk [vmem:[%s597_s23 + $0x4] sm:$0xf] %vm332_vm1, %v512_v17  ;;  %v374_v27 = vsel %vm341_vm2, %v366_v19, 0.0  ;;  %v349_v35 = vsel %vm341_vm2, %v285_v15, 0.0  ;;  %v516_v36 = vpack.c.bf16 %v288_v24, %v288_v24  ;;  %v378_v39 = vsel %vm341_vm2, %v368_v26, 0.0 }
  0xec   : > { %v346_v29 = vadd.f32 %v345_v21, %v344_v22  ;;  %v375_v30 = vadd.f32 %v374_v27, %v373_v25  ;;  %340 = vst.msk [vmem:[%s597_s23 + $0x1c] sm:$0xf] %vm332_vm1, %v518_v32  ;;  %v380_v40 = vsel %vm341_vm2, %v369_v31, 0.0  ;;  %v370_v41 = vmul.f32 %v288_v24, %v288_v24 }
  0xed   : > { %338 = vst.msk [vmem:[%s597_s23 + $0x14] sm:$0xf] %vm332_vm1, %v516_v36  ;;  %v371_v44 = vmul.f32 %v532_v11, %v532_v11  ;;  %v351_v45 = vsel %vm341_vm2, %v288_v24, 0.0  ;;  %v353_v48 = vsel %vm341_vm2, %v532_v11, 0.0  ;;  %v372_v49 = vmul.f32 %v533_v20, %v533_v20 }
  0xee   : > { %v377_v37 = vadd.f32 %v376_v33, %v375_v30  ;;  %v348_v38 = vadd.f32 %v347_v34, %v346_v29  ;;  %v382_v50 = vsel %vm341_vm2, %v370_v41, 0.0  ;;  %v355_v54 = vsel %vm341_vm2, %v533_v20, 0.0 }
  0xef   : > { %v384_v53 = vsel %vm341_vm2, %v371_v44, 0.0  ;;  %v386_v57 = vsel %vm341_vm2, %v372_v49, 0.0 }
  0xf0   : > { %v350_v42 = vadd.f32 %v349_v35, %v348_v38  ;;  %v379_v43 = vadd.f32 %v378_v39, %v377_v37 }
  0xf2   : > { %v381_v46 = vadd.f32 %v380_v40, %v379_v43  ;;  %v352_v47 = vadd.f32 %v351_v45, %v350_v42 }
  0xf4   : > { %v354_v51 = vadd.f32 %v353_v48, %v352_v47  ;;  %v383_v52 = vadd.f32 %v382_v50, %v381_v46 }
  0xf6   : > { %v356_v55 = vadd.f32 %v355_v54, %v354_v51  ;;  %v385_v56 = vadd.f32 %v384_v53, %v383_v52 }
  0xf8   : > { %v357_v58 = vrot.slane %v356_v55, 4  ;;  %v387_v59 = vadd.f32 %v386_v57, %v385_v56 }
  0xfa   : > { %v358_v60 = vadd.f32 %v357_v58, %v356_v55  ;;  %v388_v61 = vrot.slane %v387_v59, 4 }
  0xfc   : > { %v359_v62 = vrot.slane %v358_v60, 2  ;;  %v389_v63 = vadd.f32 %v388_v61, %v387_v59 }
  0xfe   : > { %v360_v0 = vadd.f32 %v359_v62, %v358_v60  ;;  %v390_v1 = vrot.slane %v389_v63, 2 }
 0x100   : > { %v361_v2 = vrot.slane %v360_v0, 1  ;;  %v391_v3 = vadd.f32 %v390_v1, %v389_v63 }
 0x102   : > { %v362_v4 = vadd.f32 %v361_v2, %v360_v0  ;;  %v392_v5 = vrot.slane %v391_v3, 1 }
 0x104   : > { %364 = vst.msk [vmem:[%s184_s27] sm:$0x1] %vm363_vm3, %v362_v4  ;;  %v393_v6 = vadd.f32 %v392_v5, %v391_v3 }
 0x106   : > { %394 = vst.msk [vmem:[%s184_s27 + $0x1] sm:$0x1] %vm363_vm3, %v393_v6 }
 0x107 PF: > { %s14_s12 = sadd.s32 1, %s555_s12  }
 0x108   : > { %p11_p5 = scmp.ge.s32.totalorder %s14_s12, 4  }
 0x10a   :  { %13 = sbr.rel (!%p11_p5) target bundleno = 1 (0x1), region = 70 }

// kernel: bottleneck_forward.7
= control target key start
LH: loop header
LB: loop body
LE: loop exit
PB: predicated region body
PF: predicated region fallthrough
CT: control target
= control target key end

     0   :  { %s518_s18 = smov 0   ;;  %s552_s0 = inlined_call_operand.vmem [shape: bf16[32,6], index: 0, kind: input, shape index: {}]   ;;  %s553_s1 = inlined_call_operand.vmem [shape: f32[1,6], index: 1, kind: input, shape index: {}]   ;;  %s554_s2 = inlined_call_operand.vmem [shape: f32[1,6], index: 2, kind: input, shape index: {}]   ;;  %s555_s3 = inlined_call_operand.vmem [shape: bf16[6,32], index: 3, kind: input, shape index: {}]   ;;  %s556_s4 = inlined_call_operand.vmem [shape: bf16[32,32], index: 4, kind: output, shape index: {0}]   ;;  %s557_s5 = inlined_call_operand.vmem [shape: f32[16,32], index: 5, kind: output, shape index: {1}]  }
   0x1 LB: > { %s524_s19 = sadd.s32 4294967295, %s484_s18   ;;  %p441_p0 = scmp.ge.s32.totalorder %s484_s18, 1  ;;  %s484_s18 = sphi %s518_s18, %s16_s18  }
   0x2   : > { %p191_p1 = scmp.lt.s32.totalorder %s484_s18, 3 }
   0x4   : > { %p192_p2 = pnand %p441_p0, %p191_p1 }
   0x5   : > { %v265_v0 = vld [vmem:[%s555_s3] sm:$0x7] (!%p192_p2)  ;;  %vm270_vm0 = vcmask (!%p192_p2), 1042432   ;;  %s442_s22 = sshll.u32 (!%p192_p2), %s524_s19, 1  ;;  %v486_v1 = vmov (!%p192_p2), 0.0   ;;  %vm487_vm1 = vmmov (!%p192_p2), 0  }
   0x6   : > { %195 = sbr.rel (%p192_p2) target bundleno = 259 (0x103), region = 36  ;;  %462 = vmatprep.subr.bf16.mxu0 (!%p192_p2), %v486_v1  ;;  %v272_v2 = vsel (!%p192_p2), %vm270_vm0, %v265_v0, 0  ;;  %464 = vmatprep.mubr.msk.bf16.mxu0 (!%p192_p2), %vm487_vm1, %v486_v1  ;;  %p224_p3 = scmp.lt.s32.totalorder (!%p192_p2), %s442_s22, 3  ;;  %v447_v4 = vld [vmem:[%s553_s1] ss:$0 sm:$0xff] (!%p192_p2)  ;;  %vm266_vm2 = vcmask (!%p192_p2), 48128  }
   0x7   : > { %463 = vmatpush3.bf16.msra.mxu0 (!%p192_p2), %v272_v2  ;;  %v448_v7 = vld [vmem:[%s554_s2] ss:$0 sm:$0xff] (!%p192_p2)  ;;  %vm323_vm3 = vcmask (!%p192_p2), 257024   ;;  %vm326_vm4 = vcmask (!%p192_p2), 261120   ;;  %p235_p4 = scmp.lt.s32.totalorder (!%p192_p2), %s524_s19, 1  ;;  %vm336_vm5 = vcmask (!%p192_p2), 253952  }
   0xd   : > { %s559_s22 = smov (!%p224_p3, %s442_s22), 3  ;;  %s561_s19 = smov (!%p235_p4, %s524_s19), 1 }
   0xe   : > { %s443_s23 = sshll.u32 %s559_s22, 2  ;;  %s446_s9 = sshll.u32 %s561_s19, 3 }
   0xf   : > { %s227_s26 = scalar_lea.vmem %s552_s0, %s443_s23  ;;  %s233_s8 = scalar_lea.vmem %s556_s4, %s443_s23 }
  0x10   : > { %v457_v3 = vld [vmem:[%s227_s26] sm:$0xff]   ;;  %s238_s12 = scalar_lea.vmem %s557_s5, %s446_s9 }
  0x11   : > { %v458_v5 = vunpack.c.l.bf16 %v457_v3  ;;  %v459_v6 = vunpack.c.h.bf16 %v457_v3 }
  0x13   : > { %v251_v8 = vmul.f32 %v458_v5, %v447_v4  ;;  %v252_v9 = vmul.f32 %v459_v6, %v447_v4 }
  0x15   : > { %v260_v10 = vadd.f32 %v448_v7, %v251_v8  ;;  %v261_v11 = vadd.f32 %v448_v7, %v252_v9 }
  0x17   : > { %v262_v12 = vmax.f32 %v260_v10, 0.0  ;;  %v263_v13 = vmax.f32 %v261_v11, 0.0 }
  0x19   : > { %v264_v14 = vpack.c.bf16 %v263_v13, %v262_v12 }
  0x1b   : > { %465 = vmatmul.mubr.msk.bf16.vlgmr.msra.gmra.mrb[0].mxu0 %vm266_vm2, %v264_v14 }
  0xee   : > { %v308_v15 = vpop.f32.mrb[0].mxu0 }
  0xef   : > { %v454_v16 = vpack.c.bf16 %v308_v15, %v308_v15  ;;  %v338_v17 = vmul.f32 %v308_v15, %v308_v15  ;;  %v466_v18 = vpop.f32.mrb[1].mxu0  ;;  %v327_v20 = vsel %vm326_vm4, %v308_v15, 0.0 }
  0xf0   : > { %v311_v19 = vpop.f32.mrb[2].mxu0 }
  0xf1   : > { %324 = vst.msk [vmem:[%s233_s8] sm:$0xf] %vm323_vm3, %v454_v16  ;;  %v455_v21 = vpack.c.bf16 %v311_v19, %v311_v19  ;;  %v328_v22 = vsel %vm326_vm4, %v311_v19, 0.0  ;;  %v339_v23 = vmul.f32 %v311_v19, %v311_v19  ;;  %v467_v24 = vpop.f32.mrb[3].mxu0  ;;  %v340_v26 = vsel %vm326_vm4, %v338_v17, 0.0 }
  0xf2   : > { %v329_v25 = vadd.f32 %v328_v22, %v327_v20 }
  0xf3   : > { %325 = vst.msk [vmem:[%s233_s8 + $0x4] sm:$0xf] %vm323_vm3, %v455_v21  ;;  %v341_v27 = vsel %vm326_vm4, %v339_v23, 0.0 }
  0xf4   : > { %v330_v28 = vrot.slane %v329_v25, 4  ;;  %v342_v29 = vadd.f32 %v341_v27, %v340_v26 }
  0xf6   : > { %v331_v30 = vadd.f32 %v330_v28, %v329_v25  ;;  %v343_v31 = vrot.slane %v342_v29, 4 }
  0xf8   : > { %v332_v32 = vrot.slane %v331_v30, 2  ;;  %v344_v33 = vadd.f32 %v343_v31, %v342_v29 }
  0xfa   : > { %v333_v34 = vadd.f32 %v332_v32, %v331_v30  ;;  %v345_v35 = vrot.slane %v344_v33, 2 }
  0xfc   : > { %v334_v36 = vrot.slane %v333_v34, 1  ;;  %v346_v37 = vadd.f32 %v345_v35, %v344_v33 }
  0xfe   : > { %v335_v38 = vadd.f32 %v334_v36, %v333_v34  ;;  %v347_v39 = vrot.slane %v346_v37, 1 }
 0x100   : > { %337 = vst.msk [vmem:[%s238_s12] sm:$0x1] %vm336_vm5, %v335_v38  ;;  %v348_v40 = vadd.f32 %v347_v39, %v346_v37 }
 0x102   : > { %349 = vst.msk [vmem:[%s238_s12 + $0x1] sm:$0x1] %vm336_vm5, %v348_v40 }
 0x103 PF: > { %s16_s18 = sadd.s32 1, %s484_s18  }
 0x104   : > { %p13_p5 = scmp.ge.s32.totalorder %s16_s18, 4  }
 0x106   :  { %15 = sbr.rel (!%p13_p5) target bundleno = 1 (0x1), region = 78 }

// kernel: bottleneck_forward.9
= control target key start
LH: loop header
LB: loop body
LE: loop exit
PB: predicated region body
PF: predicated region fallthrough
CT: control target
= control target key end

     0   :  { %11 = vsyncpa [#allocation3], 0  ;;  %s705_s0 = inlined_call_operand.vmem [shape: bf16[32,32], index: 0, kind: input, shape index: {}]   ;;  %s706_s1 = inlined_call_operand.vmem [shape: f32[1,32], index: 1, kind: input, shape index: {}]   ;;  %s707_s2 = inlined_call_operand.vmem [shape: f32[1,32], index: 2, kind: input, shape index: {}]   ;;  %s708_s3 = inlined_call_operand.vmem [shape: bf16[32,32], index: 3, kind: input, shape index: {}]   ;;  %s709_s4 = inlined_call_operand.vmem [shape: f32[1,32], index: 4, kind: input, shape index: {}]   ;;  %s710_s5 = inlined_call_operand.vmem [shape: f32[1,32], index: 5, kind: input, shape index: {}]   ;;  %s711_s6 = inlined_call_operand.hbm [shape: f32[32,32], index: 6, kind: output, shape index: {}]  }
   0x1   :  { %13 = vsyncpa [#allocation3 + $0x1], 0  ;;  %s584_s21 = smov 0   ;;  %s586_s22 = smov 0  }
   0x2   :  { %s588_s23 = smov 0   ;;  %s590_s24 = smov 0  }
   0x3 LB: > { %s605_s25 = sadd.s32 4294967295, %s544_s24   ;;  %s414_s26 = sadd.s32 4294967294, %s544_s24   ;;  %s544_s24 = sphi %s590_s24, %s717_s24   ;;  %s540_s23 = sphi %s588_s23, %s716_s23   ;;  %s536_s22 = sphi %s586_s22, %s715_s22   ;;  %s532_s21 = sphi %s584_s21, %s714_s21  }
   0x4   : > { %s609_s27 = sadd.s32 1, %s544_s24   ;;  %s162_s28 = sadd.s32 1, %s540_s23 }
   0x5   : > { %s159_s29 = ssub.s32 %s544_s24, %s609_s27  ;;  %p172_p0 = scmp.ne.s32.totalorder %s540_s23, %s536_s22 }
   0x6   : > { %p160_p1 = scmp.eq.s32.totalorder %s159_s29, 0  ;;  %p173_p2 = scmp.eq.s32.totalorder %s605_s25, 1 }
   0x7   : > { %p178_p3 = scmp.ne.s32.totalorder %s536_s22, %s532_s21  ;;  %p179_p4 = scmp.eq.s32.totalorder %s414_s26, 1 }
   0x8   : > { %s620_s30 = scalar_select %p160_p1, %s540_s23, %s162_s28  }
   0x9   : > { %p622_p5 = por %p173_p2, %p172_p0  ;;  %p626_p6 = por %p179_p4, %p178_p3 }
   0xa   : > { %p417_p7 = scmp.ge.s32.totalorder %s544_s24, 1  ;;  %p227_p8 = scmp.lt.s32.totalorder %s544_s24, 3 }
   0xc   : > { %p228_p9 = pnand %p417_p7, %p227_p8 }
   0xd   : > { %s419_s9 = sshll.u32 (!%p228_p9), %s605_s25, 1  ;;  %s259_s10 = sand.u32 (!%p228_p9), 1, %s536_s22   ;;  %v423_v0 = vld [vmem:[%s706_s1] ss:$0 sm:$0xff] (!%p228_p9)  ;;  %vm323_vm0 = vcmask (!%p228_p9), 261120  }
   0xe   : > { %231 = sbr.rel (%p228_p9) target bundleno = 52 (0x34), region = 44  ;;  %p263_p10 = scmp.lt.s32.totalorder (!%p228_p9), %s419_s9, 3  ;;  %v425_v3 = vld [vmem:[%s709_s4] ss:$0 sm:$0xff] (!%p228_p9) }
   0xf   : > { %s418_s28 = sshll.u32 (!%p228_p9), %s259_s10, 4  ;;  %v424_v8 = vld [vmem:[%s707_s2] ss:$0 sm:$0xff] (!%p228_p9)  ;;  %s432_s15 = sshll.u32 (!%p228_p9), %s605_s25, 8 }
  0x10   : > { %v426_v15 = vld [vmem:[%s710_s5] ss:$0 sm:$0xff] (!%p228_p9)  ;;  %s261_s13 = scalar_lea.vmem (!%p228_p9), [#allocation2], %s418_s28  ;;  %s660_s18 = scalar_lea.hbm (!%p228_p9), %s711_s6, %s432_s15 }
  0x11   : > { %s664_s19 = scalar_lea.sflag (!%p228_p9), [#allocation3], %s259_s10  ;;  %s546_s20 = smov (!%p228_p9), [#allocation2]  }
  0x12   : > { %s486_s26 = sshll.u32 (!%p228_p9), %s546_s20, 4  ;;  %s487_s26 = int_to_ptr.vmem [resolvable:$false] %s486_s26 }
  0x13   : > { %s488_s28 = scalar_lea.vmem (!%p228_p9), %s487_s26, 512 }
  0x15   : > { %s719_s9 = smov (!%p263_p10, %s419_s9), 3 }
  0x16   : > { %s420_s11 = sshll.u32 %s719_s9, 2 }
  0x17   : > { %s266_s14 = scalar_lea.vmem %s705_s0, %s420_s11  ;;  %s272_s17 = scalar_lea.vmem %s708_s3, %s420_s11 }
  0x18   : > { %v434_v1 = vld [vmem:[%s266_s14] sm:$0xff]   ;;  %s340_s14 = sshll.u32 %s261_s13, 4  ;;  %s655_s14 = int_to_ptr.vmem [resolvable:$true] %s340_s14 }
  0x19   : > { %v438_v2 = vld [vmem:[%s272_s17] sm:$0xff]   ;;  %v435_v4 = vunpack.c.l.bf16 %v434_v1  ;;  %v436_v6 = vunpack.c.h.bf16 %v434_v1  ;;  %s482_s25 = scalar_lea.vmem %s655_s14, 256  ;;  %p489_p0 = scmp.lt.s32.totalorder %s655_s14, %s487_s26 }
  0x1a   : > { %v439_v5 = vunpack.c.l.bf16 %v438_v2  ;;  %v440_v7 = vunpack.c.h.bf16 %v438_v2  ;;  %p483_p11 = scmp.ne.s32.totalorder %s655_s14, %s482_s25  ;;  %p490_p1 = scmp.lt.s32.totalorder %s488_s28, %s482_s25 }
  0x1b   : > { %v286_v9 = vmul.f32 %v435_v4, %v423_v0  ;;  %v287_v11 = vmul.f32 %v436_v6, %v423_v0 }
  0x1c   : > { %v308_v10 = vmul.f32 %v439_v5, %v425_v3  ;;  %v309_v12 = vmul.f32 %v440_v7, %v425_v3  ;;  %p484_p12 = pnand %p483_p11, %p622_p5  ;;  %p491_p2 = por %p490_p1, %p489_p0 }
  0x1d   : > { %v295_v13 = vadd.f32 %v424_v8, %v286_v9  ;;  %v296_v14 = vadd.f32 %v424_v8, %v287_v11 }
  0x1e   : > { %p485_p13 = pneg %p484_p12 }
  0x1f   : > { %v310_v16 = vadd.f32 %v308_v10, %v295_v13  ;;  %v311_v17 = vadd.f32 %v309_v12, %v296_v14 }
  0x20   : > { %p492_p3 = pnand %p491_p2, %p485_p13 }
  0x21   : > { %v319_v18 = vadd.f32 %v426_v15, %v310_v16  ;;  %v320_v19 = vadd.f32 %v426_v15, %v311_v17 }
  0x23   : > { %v321_v20 = vmax.f32 %v319_v18, 0.0  ;;  %v322_v21 = vmax.f32 %v320_v19, 0.0 }
  0x25   : > { %324 = vst.msk [vmem:[%s261_s13] sm:$0xff] %vm323_vm0, %v321_v20  ;;  %325 = vst.msk [vmem:[%s261_s13 + $0x8] sm:$0xff] %vm323_vm0, %v322_v21 }
  0x26   : > { %495 = shalt.err (!%p492_p3)
}
  0x27   : > { %s496_s10 = scalar_lea.hbm %s660_s18, 256  ;;  %s500_s11 = scalar_lea.hbm %s711_s6, 512 }
  0x28   : > { %p497_p4 = scmp.ne.s32.totalorder %s660_s18, %s496_s10  ;;  %p501_p9 = scmp.lt.u32.totalorder %s660_s18, %s711_s6 }
  0x29   : > { %p502_p10 = scmp.lt.u32.totalorder %s500_s11, %s496_s10  ;;  %p504_p12 = scmp.lt.u32.totalorder %s496_s10, %s660_s18 }
  0x2a   : > { %p498_p7 = pnand %p497_p4, %p622_p5 }
  0x2b   : > { %p503_p11 = por %p502_p10, %p501_p9 }
  0x2c   : > { %p499_p8 = pneg %p498_p7 }
  0x2d   : > { %p505_p13 = por %p504_p12, %p503_p11 }
  0x2f   : > { %p506_p0 = pnand %p505_p13, %p499_p8 }
  0x31   : > { %509 = shalt.err (!%p506_p0)
}
  0x32   : > { %s547_s15 = smov 128   ;;  %s548_s16 = smov 8  }
  0x33   : > { %441 = dma.vmem_to_hbm [thread:$0]  (%p622_p5), %s655_s14, 256, %s660_s18, %s664_s19, %s547_s15, %s547_s15, %s548_s16  }
  0x34 PF: > { %p447_p1 = scmp.ge.s32.totalorder %s544_s24, 2  ;;  %s355_s17 = sand.u32 1, %s532_s21  }
  0x35   : > { %s356_s25 = scalar_lea.sflag [#allocation3], %s355_s17 }
  0x36   : > { %p444_p2 = pnand %p447_p1, %p626_p6 }
  0x38   : > { %527 = dma.done.wait (!%p444_p2), %s356_s25, 256  }
  0x39   : > { %529 = vsyncadd (!%p444_p2), %s356_s25, 4294967040  ;;  %p16_p3 = scmp.ge.s32.totalorder %s609_s27, 4   ;;  %s714_s21 = smov %s536_s22 }
  0x3a   : > { %s715_s22 = smov %s540_s23  ;;  %s716_s23 = smov %s620_s30 }
  0x3b   : > { %s717_s24 = smov %s609_s27  ;;  %18 = sbr.rel (!%p16_p3) target bundleno = 3 (0x3), region = 82 }
  0x42   :  { %361 = vsyncpa [#allocation3], 1 }
  0x43   :  { %363 = vsyncpa [#allocation3 + $0x1], 1 }

// kernel: bottleneck_forward.6
= control target key start
LH: loop header
LB: loop body
LE: loop exit
PB: predicated region body
PF: predicated region fallthrough
CT: control target
= control target key end

     0   :  { %s2002_s21 = smov 0   ;;  %s2004_s22 = smov 0   ;;  %s2362_s0 = inlined_call_operand.vmem [shape: bf16[4,2,25,6], index: 0, kind: input, shape index: {}]   ;;  %s2363_s1 = inlined_call_operand.vmem [shape: f32[4,1,25,1], index: 1, kind: input, shape index: {}]   ;;  %s2364_s2 = inlined_call_operand.vmem [shape: f32[1,6], index: 2, kind: input, shape index: {}]   ;;  %s2365_s3 = inlined_call_operand.vmem [shape: f32[1,6], index: 3, kind: input, shape index: {}]   ;;  %s2366_s4 = inlined_call_operand.vmem [shape: bf16[9,6,6], index: 4, kind: input, shape index: {}]   ;;  %s2367_s5 = inlined_call_operand.vmem [shape: bf16[2,4,4,6], index: 5, kind: output, shape index: {0}]   ;;  %s2368_s6 = inlined_call_operand.vmem [shape: f32[16,6], index: 6, kind: output, shape index: {1}]  }
   0x1   :  { %s2006_s23 = smov 0  }
   0x2 LB: > { %s1656_s24 = sadd.s32 4294967295, %s1963_s23   ;;  %s2019_s25 = sadd.s32 1, %s1963_s23   ;;  %s1963_s23 = sphi %s2006_s23, %s2375_s23   ;;  %s1959_s22 = sphi %s2004_s22, %s2374_s22   ;;  %s1955_s21 = sphi %s2002_s21, %s2373_s21  }
   0x3   : > { %s21_s26 = ssub.s32 %s1963_s23, %s2019_s25  ;;  %s24_s27 = sadd.s32 1, %s1959_s22 }
   0x4   : > { %p22_p0 = scmp.eq.s32.totalorder %s21_s26, 0  ;;  %p31_p1 = scmp.ne.s32.totalorder %s1959_s22, %s1955_s21 }
   0x5   : > { %p32_p2 = scmp.eq.s32.totalorder %s1963_s23, 0  ;;  %p1659_p4 = scmp.ge.s32.totalorder %s1963_s23, 2 }
   0x6   : > { %s2028_s28 = scalar_select %p22_p0, %s1959_s22, %s24_s27  }
   0x7   : > { %p33_p3 = por %p32_p2, %p31_p1  ;;  %205 = sbr.rel (%p1659_p4) target bundleno = 22 (0x16), region = 32 }
   0xe   : > { %208 = sbr.rel (!%p33_p3) target bundleno = 22 (0x16), region = 36  ;;  %s210_s29 = sand.u32 (%p33_p3), 1, %s1959_s22  }
   0xf   : > { %s1762_s30 = sshll.u32 (%p33_p3), %s1963_s23, 4  ;;  %s1660_s7 = sshll.u32 (%p33_p3), %s210_s29, 6 }
  0x10   : > { %s215_s10 = scalar_lea.vmem (%p33_p3), %s2362_s0, %s1762_s30  ;;  %s212_s11 = scalar_lea.vmem (%p33_p3), [#allocation4], %s1660_s7 }
  0x11   : > { %v231_v0 = vld [vmem:[%s215_s10] sm:$0xff] (%p33_p3)   ;;  %v235_v1 = vld [vmem:[%s215_s10 + $0x8] sm:$0xff] (%p33_p3)  }
  0x12   : > { %v239_v2 = vld [vmem:[%s215_s10 + $0x20] sm:$0xff] (%p33_p3)   ;;  %232 = vst [vmem:[%s212_s11] sm:$0xff] (%p33_p3), %v231_v0   ;;  %236 = vst [vmem:[%s212_s11 + $0x8] sm:$0xff] (%p33_p3), %v235_v1   ;;  %v243_v3 = vld [vmem:[%s215_s10 + $0x28] sm:$0xff] (%p33_p3)  }
  0x13   : > { %240 = vst [vmem:[%s212_s11 + $0x10] sm:$0xff] (%p33_p3), %v239_v2   ;;  %v247_v4 = vld [vmem:[%s215_s10 + $0x40] sm:$0xff] (%p33_p3)   ;;  %v251_v5 = vld [vmem:[%s215_s10 + $0x48] sm:$0xff] (%p33_p3)   ;;  %244 = vst [vmem:[%s212_s11 + $0x18] sm:$0xff] (%p33_p3), %v243_v3  }
  0x14   : > { %248 = vst [vmem:[%s212_s11 + $0x20] sm:$0xff] (%p33_p3), %v247_v4   ;;  %252 = vst [vmem:[%s212_s11 + $0x28] sm:$0xff] (%p33_p3), %v251_v5   ;;  %v255_v6 = vld [vmem:[%s215_s10 + $0x60] sm:$0xff] (%p33_p3)   ;;  %v259_v7 = vld [vmem:[%s215_s10 + $0x68] sm:$0xff] (%p33_p3)  }
  0x15   : > { %256 = vst [vmem:[%s212_s11 + $0x30] sm:$0xff] %v255_v6   ;;  %260 = vst [vmem:[%s212_s11 + $0x38] sm:$0xff] %v259_v7  }
  0x16 PF: > { %p1663_p5 = scmp.ge.s32.totalorder %s1963_s23, 1  ;;  %p316_p6 = scmp.lt.s32.totalorder %s1963_s23, 3 }
  0x18   : > { %p317_p7 = pnand %p1663_p5, %p316_p6 }
  0x19   : > { %v402_v8 = vld [vmem:[%s2363_s1 + $0x10] sm:$0xff] (!%p317_p7)  ;;  %v400_v9 = vld [vmem:[%s2363_s1] sm:$0xff] (!%p317_p7)  ;;  %v1965_v10 = vmov (!%p317_p7), 0   ;;  %v401_v12 = vld [vmem:[%s2363_s1 + $0x8] sm:$0xff] (!%p317_p7)  ;;  %vm692_vm0 = vcmask (!%p317_p7), 1042432   ;;  %s323_s16 = sand.u32 (!%p317_p7), 1, %s1955_s21  }
  0x1a   : > { %320 = sbr.rel (%p317_p7) target bundleno = 497 (0x1f1), region = 77  ;;  %1922 = vset.pattern.permute.xlu1 (!%p317_p7), %v1965_v10  ;;  %1921 = vset.pattern.permute.xlu0 (!%p317_p7), %v1965_v10  ;;  %v1678_v11 = vld [vmem:[%s2363_s1 + $0x20] sm:$0xff] (!%p317_p7)  ;;  %v1680_v13 = vld [vmem:[%s2363_s1 + $0x30] sm:$0xff] (!%p317_p7)  ;;  %v1679_v14 = vld [vmem:[%s2363_s1 + $0x28] sm:$0xff] (!%p317_p7)  ;;  %s1664_s17 = sshll.u32 (!%p317_p7), %s323_s16, 6  ;;  %vm444_vm1 = vcmask (!%p317_p7), 44032  }
  0x1b   : > { %416 = vperm.xlu1 (!%p317_p7), %1922, %v402_v8   ;;  %406 = vperm.xlu0 (!%p317_p7), %1921, %v400_v9   ;;  %v1691_v15 = vld [vmem:[%s2363_s1 + $0x48] sm:$0xff] (!%p317_p7)  ;;  %v1690_v16 = vld [vmem:[%s2363_s1 + $0x40] sm:$0xff] (!%p317_p7)  ;;  %v1692_v18 = vld [vmem:[%s2363_s1 + $0x50] sm:$0xff] (!%p317_p7)  ;;  %s2111_s18 = scalar_lea.vmem (!%p317_p7), [#allocation4], %s1664_s17  ;;  %vm685_vm2 = vcmask (!%p317_p7), 48128   ;;  %vm448_vm4 = vcmask (!%p317_p7), 40960  }
  0x1c   : > { %v1702_v17 = vld [vmem:[%s2363_s1 + $0x60] sm:$0xff] (!%p317_p7)  ;;  %v1704_v21 = vld [vmem:[%s2363_s1 + $0x70] sm:$0xff] (!%p317_p7)  ;;  %v1703_v22 = vld [vmem:[%s2363_s1 + $0x68] sm:$0xff] (!%p317_p7)  ;;  %vm840_vm3 = vsmask.f32 (!%p317_p7), 7424  ;;  %vm1383_vm8 = vcmask (!%p317_p7), 1044480  }
  0x1d   : > { %v676_v19 = vld [vmem:[%s2366_s4] sm:$0x7] (!%p317_p7)  ;;  %v1714_v23 = vld [vmem:[%s2366_s4 + $0x4] sm:$0x7] (!%p317_p7)  ;;  %v1681_v25 = vld [vmem:[%s2363_s1 + $0x38] sm:$0x1] (!%p317_p7) }
  0x1e   : > { %1880 = vmatprep.subr.msk.bf16.mxu0 (!%p317_p7), %vm692_vm0, %v676_v19  ;;  %v694_v20 = vsel (!%p317_p7), %vm692_vm0, %v676_v19, 0  ;;  %1881 = vmatprep.subr.msk.bf16.mxu1 (!%p317_p7), %vm692_vm0, %v1714_v23  ;;  %v768_v24 = vsel (!%p317_p7), %vm692_vm0, %v1714_v23, 0  ;;  %v403_v26 = vld [vmem:[%s2363_s1 + $0x18] sm:$0x1] (!%p317_p7)  ;;  %v2093_v27 = vld [vmem:[%s2366_s4 + $0x8] sm:$0x7] (!%p317_p7) }
  0x1f   : > { %482 = vperm.xlu1 (!%p317_p7), %1922, %v1678_v11   ;;  %411 = vperm.xlu0 (!%p317_p7), %1921, %v401_v12   ;;  %v1705_v28 = vld [vmem:[%s2363_s1 + $0x78] sm:$0x1] (!%p317_p7)  ;;  %v2106_v30 = vld [vmem:[%s2366_s4 + $0xc] sm:$0x7] (!%p317_p7)  ;;  %v370_v31 = vld [vmem:[%s2111_s18 + $0x8] ss:$16 sps:$4 sm:$0xff] (!%p317_p7)  }
  0x20   : > { %1827 = vmatpush3.bf16.msra.mxu0 (!%p317_p7), %v694_v20  ;;  %1833 = vmatpush3.bf16.msra.mxu1 (!%p317_p7), %v768_v24  ;;  %v1693_v29 = vld [vmem:[%s2363_s1 + $0x58] sm:$0x1] (!%p317_p7)  ;;  %v374_v33 = vunpack.c.l.bf16 (!%p317_p7), %v370_v31  ;;  %v2118_v35 = vld [vmem:[%s2364_s2] ss:$0 sm:$0xff] (!%p317_p7)  ;;  %v1796_v36 = vld [vmem:[%s2111_s18 + $0x10] sm:$0xff] (!%p317_p7)   ;;  %v461_v42 = vunpack.c.h.bf16 (!%p317_p7), %v370_v31  ;;  %vm746_vm9 = vcmask (!%p317_p7), 43008  }
  0x21   : > { %1882 = vmatprep.subr.msk.bf16.mxu0 %vm692_vm0, %v2093_v27  ;;  %1883 = vmatprep.subr.msk.bf16.mxu1 %vm692_vm0, %v2106_v30  ;;  %v1781_v32 = vld [vmem:[%s2111_s18] sm:$0xff]   ;;  %v1786_v39 = vunpack.c.l.bf16 %v1796_v36  ;;  %v2126_v41 = vld [vmem:[%s2365_s3] ss:$0 sm:$0xff]  ;;  %v1787_v43 = vunpack.c.h.bf16 %v1796_v36  ;;  %v1798_v49 = vld [vmem:[%s2111_s18 + $0x30] sm:$0xff]   ;;  %vm449_vm5 = vsmask.f32 256 }
  0x22   : > { %v1782_v34 = vunpack.c.l.bf16 %v1781_v32  ;;  %v384_v37 = vmul.f32 %v2118_v35, %v374_v33  ;;  %v1783_v40 = vunpack.c.h.bf16 %v1781_v32  ;;  %v1797_v48 = vld [vmem:[%s2111_s18 + $0x20] sm:$0xff]   ;;  %v1688_v50 = vld [vmem:[%s2111_s18 + $0x28] ss:$16 sps:$4 sm:$0xff]   ;;  %v465_v51 = vmul.f32 %v2118_v35, %v461_v42  ;;  %v1677_v55 = vld [vmem:[%s2111_s18 + $0x1c] sm:$0x1]  ;;  %p356_p8 = scmp.lt.s32.totalorder %s1656_s24, 1 }
  0x23   : > { %492 = vperm.xlu1 %1922, %v1680_v13   ;;  %487 = vperm.xlu0 %1921, %v1679_v14   ;;  %v463_v46 = vmul.f32 %v1786_v39, %v2118_v35  ;;  %v464_v52 = vmul.f32 %v1787_v43, %v2118_v35  ;;  %v1791_v53 = vunpack.c.h.bf16 %v1797_v48  ;;  %v1790_v54 = vunpack.c.l.bf16 %v1797_v48  ;;  %v371_v56 = vld [vmem:[%s2111_s18 + $0xc] sm:$0x1]  ;;  %vm2225_vm7 = vmand %vm448_vm4, %vm449_vm5 }
  0x24   : > { %v382_v38 = vmul.f32 %v1782_v34, %v2118_v35  ;;  %v394_v44 = vadd.f32 %v2126_v41, %v384_v37  ;;  %v383_v47 = vmul.f32 %v1783_v40, %v2118_v35  ;;  %v1794_v61 = vunpack.c.l.bf16 %v1798_v49  ;;  %s2377_s24 = smov (!%p356_p8, %s1656_s24), 1 }
  0x25   : > { %v467_v59 = vadd.f32 %v2126_v41, %v463_v46  ;;  %v534_v62 = vunpack.c.l.bf16 %v1688_v50  ;;  %v607_v63 = vunpack.c.h.bf16 %v1688_v50  ;;  %v1795_v0 = vunpack.c.h.bf16 %v1798_v49  ;;  %s1763_s14 = sshll.u32 %s2377_s24, 3 }
  0x26   : > { %v392_v45 = vadd.f32 %v2126_v41, %v382_v38  ;;  %v398_v57 = vmax.f32 %v394_v44, 0.0  ;;  %v393_v60 = vadd.f32 %v2126_v41, %v383_v47  ;;  %v462_v1 = vunpack.c.l.bf16 %v1677_v55  ;;  %v1689_v38 = vld [vmem:[%s2111_s18 + $0x2c] sm:$0x1]  ;;  %s360_s16 = scalar_lea.vmem %s2367_s5, %s1763_s14  ;;  %s364_s19 = scalar_lea.vmem %s2368_s6, %s1763_s14 }
  0x27   : > { %560 = vperm.xlu1 %1922, %v1691_v15   ;;  %555 = vperm.xlu0 %1921, %v1690_v16   ;;  %v375_v2 = vunpack.c.l.bf16 %v371_v56  ;;  %v469_v5 = vadd.f32 %v2126_v41, %v465_v51  ;;  %v468_v6 = vadd.f32 %v2126_v41, %v464_v52  ;;  %v537_v7 = vmul.f32 %v1791_v53, %v2118_v35 }
  0x28   : > { %v396_v58 = vmax.f32 %v392_v45, 0.0  ;;  %v536_v8 = vmul.f32 %v1790_v54, %v2118_v35  ;;  %v471_v11 = vmax.f32 %v467_v59, 0.0  ;;  %v397_v12 = vmax.f32 %v393_v60, 0.0 }
  0x29   : > { %v609_v13 = vmul.f32 %v1794_v61, %v2118_v35  ;;  %v538_v14 = vmul.f32 %v2118_v35, %v534_v62  ;;  %v611_v15 = vmul.f32 %v2118_v35, %v607_v63  ;;  %v610_v16 = vmul.f32 %v1795_v0, %v2118_v35 }
  0x2a   : > { %v466_v20 = vmul.f32 %v2118_v35, %v462_v1  ;;  %v473_v24 = vmax.f32 %v469_v5, 0.0  ;;  %v472_v31 = vmax.f32 %v468_v6, 0.0  ;;  %v535_v51 = vunpack.c.l.bf16 %v1689_v38 }
  0x2b   : > { %628 = vperm.xlu1 %1922, %v1702_v17   ;;  %565 = vperm.xlu0 %1921, %v1692_v18   ;;  %v1701_v17 = vld [vmem:[%s2111_s18 + $0x3c] sm:$0x1]  ;;  %v613_v33 = vadd.f32 %v2126_v41, %v609_v13  ;;  %v542_v34 = vadd.f32 %v2126_v41, %v538_v14  ;;  %v2159_v36 = vadd.f32 %v2126_v41, %v611_v15  ;;  %vm1187_vm6 = vsmask.f32 5376 }
  0x2c   : > { %v608_v32 = vunpack.c.l.bf16 %v1701_v17  ;;  %v2162_v37 = vadd.f32 %v2126_v41, %v610_v16  ;;  %v2166_v42 = vadd.f32 %v2126_v41, %v466_v20  ;;  %v1734_v16 = vld [vmem:[%s2366_s4 + $0x14] sm:$0x7] }
  0x2d   : > { %v617_v52 = vmax.f32 %v613_v33, 0.0  ;;  %v546_v53 = vmax.f32 %v542_v34, 0.0  ;;  %v619_v54 = vmax.f32 %v2159_v36, 0.0  ;;  %v2209_v38 = vsel %vm692_vm0, %v1734_v16, 0 }
  0x2e   : > { %v612_v50 = vmul.f32 %v2118_v35, %v608_v32  ;;  %v618_v55 = vmax.f32 %v2162_v37, 0.0 }
  0x2f   : > { %638 = vperm.xlu1 %1922, %v1704_v21   ;;  %633 = vperm.xlu0 %1921, %v1703_v22   ;;  %v385_v21 = vmul.f32 %v2118_v35, %v375_v2  ;;  %v539_v2 = vmul.f32 %v2118_v35, %v535_v51 }
  0x30   : > { %v2181_v1 = vadd.f32 %v2126_v41, %v612_v50  ;;  %v451_v50 = vld [vmem:[#allocation2 + $0xc] sm:$0x1] }
  0x31   : > { %v2169_v43 = vadd.f32 %v2126_v41, %v385_v21  ;;  %v2193_v15 = vadd.f32 %v2126_v41, %v539_v2 }
  0x32   : > { %v620_v14 = vmax.f32 %v2181_v1, 0.0 }
  0x33   : > { %497 = vperm.xlu1 %1922, %v1681_v25   ;;  %421 = vperm.xlu0 %1921, %v403_v26   ;;  %v541_v25 = vadd.f32 %v2126_v41, %v537_v7  ;;  %v540_v26 = vadd.f32 %v2126_v41, %v536_v8  ;;  %v399_v59 = vmax.f32 %v2169_v43, 0.0  ;;  %v547_v36 = vmax.f32 %v2193_v15, 0.0 }
  0x35   : > { %v545_v46 = vmax.f32 %v541_v25, 0.0  ;;  %v544_v47 = vmax.f32 %v540_v26, 0.0 }
  0x37   : > { %643 = vperm.xlu1 %1922, %v1705_v28   ;;  %570 = vperm.xlu0 %1921, %v1693_v29  }
  0x9a   : > { %v417_v3 = vpop.permute.xlu1 %416  ;;  %v407_v4 = vpop.permute.xlu0 %406 }
  0x9b   : > { %v426_v9 = vmul.f32 %v417_v3, %v398_v57  ;;  %v424_v10 = vmul.f32 %v407_v4, %v396_v58  ;;  %v474_v58 = vmax.f32 %v2166_v42, 0.0  ;;  %v863_v3 = vsel %vm692_vm0, %v2093_v27, 0 }
  0x9d   : > { %v1766_v18 = vpack.c.bf16 %v426_v9, %v426_v9  ;;  %v1764_v19 = vpack.c.bf16 %v424_v10, %v424_v10 }
  0x9e   : > { %v483_v22 = vpop.permute.xlu1 %482  ;;  %v412_v23 = vpop.permute.xlu0 %411 }
  0x9f   : > { %447 = vst.msk [vmem:[#allocation2 + $0x8] sm:$0xf] %vm444_vm1, %v1766_v18  ;;  %445 = vst.msk [vmem:[#allocation2] sm:$0xf] %vm444_vm1, %v1764_v19  ;;  %v500_v28 = vmul.f32 %v483_v22, %v471_v11  ;;  %v425_v29 = vmul.f32 %v412_v23, %v397_v12  ;;  %v1729_v12 = vld [vmem:[%s2366_s4 + $0x10] sm:$0x7] }
  0xa0   : > { %v942_v19 = vsel %vm692_vm0, %v2106_v30, 0  ;;  %v1021_v37 = vsel %vm692_vm0, %v1729_v12, 0 }
  0xa1   : > { %v1768_v39 = vpack.c.bf16 %v500_v28, %v500_v28  ;;  %v1765_v40 = vpack.c.bf16 %v425_v29, %v425_v29 }
  0xa2   : > { %v493_v44 = vpop.permute.xlu1 %492  ;;  %v488_v45 = vpop.permute.xlu0 %487 }
  0xa3   : > { %521 = vst.msk [vmem:[#allocation2 + $0x10] sm:$0xf] %vm444_vm1, %v1768_v39  ;;  %446 = vst.msk [vmem:[#allocation2 + $0x4] sm:$0xf] %vm444_vm1, %v1765_v40  ;;  %v502_v48 = vmul.f32 %v493_v44, %v473_v24  ;;  %v501_v49 = vmul.f32 %v488_v45, %v472_v31 }
  0xa5   : > { %v1770_v56 = vpack.c.bf16 %v502_v48, %v502_v48  ;;  %v1769_v57 = vpack.c.bf16 %v501_v49, %v501_v49  ;;  %v524_v48 = vld [vmem:[#allocation2 + $0x1c] sm:$0x1] }
  0xa6   : > { %v561_v60 = vpop.permute.xlu1 %560  ;;  %v556_v61 = vpop.permute.xlu0 %555  ;;  %v1924_v0 = vld [vmem:[#allocation2 + $0x8] ss:$0 sps:$4 sm:$0x33]  }
  0xa7   : > { %523 = vst.msk [vmem:[#allocation2 + $0x18] sm:$0xf] %vm444_vm1, %v1770_v56  ;;  %522 = vst.msk [vmem:[#allocation2 + $0x14] sm:$0xf] %vm444_vm1, %v1769_v57  ;;  %v574_v62 = vmul.f32 %v561_v60, %v545_v46  ;;  %v573_v63 = vmul.f32 %v556_v61, %v544_v47  ;;  %v1936_v7 = vld [vmem:[#allocation2 + $0x8] ss:$0 sps:$4 sm:$0xff]  }
  0xa8   : > { %v1928_v4 = vld [vmem:[#allocation2 + $0x8] ss:$0 sps:$4 sm:$0x33]   ;;  %v1197_v21 = vshrl.u32 %v1936_v7, 16  ;;  %v1200_v41 = vshll.u32 %v1936_v7, 16 }
  0xa9   : > { %v1773_v5 = vpack.c.bf16 %v574_v62, %v574_v62  ;;  %v1772_v6 = vpack.c.bf16 %v573_v63, %v573_v63  ;;  %v849_v11 = vshll.u32 %v1928_v4, 16  ;;  %v853_v18 = vshrl.u32 %v1928_v4, 16  ;;  %v670_v4 = vld [vmem:[#allocation2 + $0x3c] sm:$0x1] }
  0xaa   : > { %v629_v8 = vpop.permute.xlu1 %628  ;;  %v566_v9 = vpop.permute.xlu0 %565  ;;  %v1923_v10 = vld [vmem:[#allocation2] sm:$0xff]   ;;  %v1199_v46 = vrot.slane %v1197_v21, 2 }
  0xab   : > { %595 = vst.msk [vmem:[#allocation2 + $0x24] sm:$0xf] %vm444_vm1, %v1773_v5  ;;  %594 = vst.msk [vmem:[#allocation2 + $0x20] sm:$0xf] %vm444_vm1, %v1772_v6  ;;  %v646_v27 = vmul.f32 %v629_v8, %v617_v52  ;;  %v575_v35 = vmul.f32 %v566_v9, %v546_v53  ;;  %v1927_v13 = vld [vmem:[#allocation2] sm:$0xff]   ;;  %1828 = vmatprep.mubr.msk.bf16.mxu0 %vm685_vm2, %v1923_v10  ;;  %v851_v17 = vrot.slane %v849_v11, 1 }
  0xac   : > { %v1935_v20 = vld [vmem:[#allocation2] sm:$0xfc]   ;;  %1829 = vmatmul.mubr.msk.bf16.vlgmr.msra.gmra.mrb[0].mxu0 %vm685_vm2, %v1924_v0  ;;  %v844_v24 = vshll.u32 %v1927_v13, 16  ;;  %v842_v29 = vshrl.u32 %v1927_v13, 16  ;;  %v597_v6 = vld [vmem:[#allocation2 + $0x2c] sm:$0x1] }
  0xad   : > { %v1776_v22 = vpack.c.bf16 %v646_v27, %v646_v27  ;;  %v1774_v23 = vpack.c.bf16 %v575_v35, %v575_v35  ;;  %1839 = vmatpush3.bf16.msra.mxu0 %v863_v3  ;;  %v1189_v34 = vshrl.u32 %v1935_v20, 16  ;;  %v1192_v39 = vshll.u32 %v1935_v20, 16  ;;  %v1744_v13 = vld [vmem:[%s2366_s4 + $0x1c] sm:$0x7] }
  0xae   : > { %v639_v25 = vpop.permute.xlu1 %638  ;;  %v634_v26 = vpop.permute.xlu0 %633  ;;  %v1925_v28 = vld [vmem:[#allocation2 + $0x10] sm:$0xff]   ;;  %v1926_v30 = vld [vmem:[#allocation2 + $0x18] ss:$0 sps:$4 sm:$0x33]   ;;  %v846_v33 = vrot.slane %v844_v24, 1  ;;  %1884 = vmatprep.subr.msk.bf16.mxu0 %vm692_vm0, %v1729_v12  ;;  %v855_v52 = vor.u32 %v853_v18, %v851_v17 }
  0xaf   : > { %667 = vst.msk [vmem:[#allocation2 + $0x30] sm:$0xf] %vm444_vm1, %v1776_v22  ;;  %596 = vst.msk [vmem:[#allocation2 + $0x28] sm:$0xf] %vm444_vm1, %v1774_v23  ;;  %v648_v31 = vmul.f32 %v639_v25, %v619_v54  ;;  %v647_v32 = vmul.f32 %v634_v26, %v618_v55  ;;  %1834 = vmatprep.mubr.msk.bf16.mxu1 %vm685_vm2, %v1925_v28  ;;  %v1937_v47 = vld [vmem:[#allocation2 + $0x10] sm:$0xfc]  }
  0xb0   : > { %1835 = vmatmul.mubr.msk.bf16.vlgmr.msra.gmra.mrb[0].mxu1 %vm685_vm2, %v1926_v30  ;;  %v847_v45 = vor.u32 %v846_v33, %v842_v29  ;;  %v1202_v54 = vrot.slane %v1200_v41, 3  ;;  %v1739_v55 = vld [vmem:[%s2366_s4 + $0x18] sm:$0x7]  ;;  %v1191_v62 = vrot.slane %v1189_v34, 2  ;;  %v1194_v42 = vrot.slane %v1192_v39, 3 }
  0xb1   : > { %v1778_v40 = vpack.c.bf16 %v648_v31, %v648_v31  ;;  %v1777_v44 = vpack.c.bf16 %v647_v32, %v647_v32  ;;  %1845 = vmatpush3.bf16.msra.mxu1 %v942_v19  ;;  %v1285_v43 = vshrl.u32 %v1937_v47, 16  ;;  %v1288_v3 = vshll.u32 %v1937_v47, 16  ;;  %v1749_v30 = vld [vmem:[%s2366_s4 + $0x20] sm:$0x7] }
  0xb2   : > { %v498_v49 = vpop.permute.xlu1 %497  ;;  %v422_v51 = vpop.permute.xlu0 %421  ;;  %v1929_v53 = vld [vmem:[#allocation2 + $0x20] sm:$0xff]   ;;  %v852_v60 = vsel %vm840_vm3, %v847_v45, %v851_v17  ;;  %1885 = vmatprep.subr.msk.bf16.mxu1 %vm692_vm0, %v1734_v16  ;;  %v1203_v10 = vor.u32 %v1202_v54, %v1199_v46  ;;  %v1195_v17 = vor.u32 %v1194_v42, %v1191_v62  ;;  %v1212_v26 = vsel %vm692_vm0, %v1739_v55, 0 }
  0xb3   : > { %669 = vst.msk [vmem:[#allocation2 + $0x38] sm:$0xf] %vm444_vm1, %v1778_v40  ;;  %668 = vst.msk [vmem:[#allocation2 + $0x34] sm:$0xf] %vm444_vm1, %v1777_v44  ;;  %v503_v56 = vmul.f32 %v498_v49, %v474_v58  ;;  %v427_v57 = vmul.f32 %v422_v51, %v399_v59  ;;  %v1933_v61 = vld [vmem:[#allocation2 + $0x20] sm:$0xff]   ;;  %1840 = vmatprep.mubr.msk.bf16.mxu0 %vm685_vm2, %v852_v60  ;;  %1846 = vmatprep.mubr.msk.bf16.mxu1 %vm685_vm2, %v1929_v53  ;;  %v1287_v18 = vrot.slane %v1285_v43, 2 }
  0xb4   : > { %v1938_v58 = vld [vmem:[#allocation2 + $0x18] ss:$0 sps:$4 sm:$0xff]   ;;  %1841 = vmatmul.mubr.msk.bf16.vlgmr.msra.gmra.mrb[4].mxu0 %vm685_vm2, %v855_v52  ;;  %v1096_v2 = vshll.u32 %v1933_v61, 16  ;;  %v1094_v9 = vshrl.u32 %v1933_v61, 16  ;;  %v1290_v1 = vrot.slane %v1288_v3, 3  ;;  %v1204_v34 = vsel %vm1187_vm6, %v1195_v17, %v1203_v10 }
  0xb5   : > { %v1771_v59 = vpack.c.bf16 %v503_v56, %v503_v56  ;;  %v1767_v0 = vpack.c.bf16 %v427_v57, %v427_v57  ;;  %1851 = vmatpush3.bf16.msra.mxu0 %v1021_v37  ;;  %v1293_v19 = vshrl.u32 %v1938_v58, 16  ;;  %v1308_v39 = vsel %vm692_vm0, %v1744_v13, 0  ;;  %v1939_v44 = vld [vmem:[#allocation2] sm:$0xf8]  }
  0xb6   : > { %v644_v5 = vpop.permute.xlu1 %643  ;;  %v571_v7 = vpop.permute.xlu0 %570  ;;  %v1930_v8 = vld [vmem:[#allocation2 + $0x28] ss:$0 sps:$4 sm:$0x33]   ;;  %1886 = vmatprep.subr.msk.bf16.mxu0 %vm692_vm0, %v1739_v55  ;;  %v1098_v16 = vrot.slane %v1096_v2, 1  ;;  %v1394_v49 = vsel %vm692_vm0, %v1749_v30, 0 }
  0xb7   : > { %v525_v11 = vsel %vm2225_vm7, %v1771_v59, %v524_v48  ;;  %v452_v12 = vsel %vm2225_vm7, %v1767_v0, %v451_v50  ;;  %v649_v27 = vmul.f32 %v644_v5, %v620_v14  ;;  %v576_v35 = vmul.f32 %v571_v7, %v547_v36  ;;  %v1934_v15 = vld [vmem:[#allocation2 + $0x28] ss:$0 sps:$4 sm:$0x33]  }
  0xb8   : > { %526 = vst [vmem:[#allocation2 + $0x1c] sm:$0x1] %v525_v11  ;;  %453 = vst [vmem:[#allocation2 + $0xc] sm:$0x1] %v452_v12  ;;  %1847 = vmatmul.mubr.msk.bf16.vlgmr.msra.gmra.mrb[4].mxu1 %vm685_vm2, %v1930_v8  ;;  %v1296_v14 = vshll.u32 %v1938_v58, 16  ;;  %v1101_v23 = vshll.u32 %v1934_v15, 16  ;;  %v1099_v29 = vor.u32 %v1098_v16, %v1094_v9  ;;  %v1291_v36 = vor.u32 %v1290_v1, %v1287_v18 }
  0xb9   : > { %v1779_v20 = vpack.c.bf16 %v649_v27, %v649_v27  ;;  %v1775_v21 = vpack.c.bf16 %v576_v35, %v576_v35  ;;  %1857 = vmatpush3.bf16.msra.mxu1 %v2209_v38  ;;  %v1295_v28 = vrot.slane %v1293_v19, 2  ;;  %v1105_v33 = vshrl.u32 %v1934_v15, 16 }
  0xba   : > { %v1931_v22 = vld [vmem:[#allocation2 + $0x30] sm:$0xff]   ;;  %v1932_v25 = vld [vmem:[#allocation2 + $0x38] ss:$0 sps:$4 sm:$0x33]   ;;  %1887 = vmatprep.subr.msk.bf16.mxu1 %vm692_vm0, %v1744_v13  ;;  %v1103_v31 = vrot.slane %v1101_v23, 1  ;;  %v1298_v32 = vrot.slane %v1296_v14, 3 }
  0xbb   : > { %v671_v24 = vsel %vm2225_vm7, %v1779_v20, %v670_v4  ;;  %v598_v41 = vsel %vm2225_vm7, %v1775_v21, %v597_v6  ;;  %1852 = vmatprep.mubr.msk.bf16.mxu0 %vm685_vm2, %v1931_v22  ;;  %v1384_v48 = vrot.slane %v1939_v44, 3 }
  0xbc   : > { %672 = vst [vmem:[#allocation2 + $0x3c] sm:$0x1] %v671_v24  ;;  %599 = vst [vmem:[#allocation2 + $0x2c] sm:$0x1] %v598_v41  ;;  %1853 = vmatmul.mubr.msk.bf16.vlgmr.msra.gmra.mrb[8].mxu0 %vm685_vm2, %v1932_v25  ;;  %v1104_v37 = vsel %vm840_vm3, %v1099_v29, %v1103_v31  ;;  %v1299_v38 = vor.u32 %v1298_v32, %v1295_v28  ;;  %v1107_v40 = vor.u32 %v1105_v33, %v1103_v31 }
  0xbd   : > { %1864 = vmatprep.mubr.msk.bf16.mxu0 %vm685_vm2, %v1204_v34  ;;  %1863 = vmatpush3.bf16.msra.mxu0 %v1212_v26 }
  0xbe   : > { %1858 = vmatprep.mubr.msk.bf16.mxu1 %vm685_vm2, %v1104_v37  ;;  %1888 = vmatprep.subr.msk.bf16.mxu0 %vm692_vm0, %v1749_v30  ;;  %v1300_v46 = vsel %vm1187_vm6, %v1291_v36, %v1299_v38 }
  0xbf   : > { %v1940_v45 = vld [vmem:[#allocation2 + $0x8] sm:$0x1f]  }
  0xc0   : > { %1859 = vmatmul.mubr.msk.bf16.vlgmr.msra.gmra.mrb[8].mxu1 %vm685_vm2, %v1107_v40  ;;  %v1385_v47 = vrot.slane %v1940_v45, 3 }
  0xc1   : > { %1870 = vmatprep.mubr.msk.bf16.mxu1 %vm685_vm2, %v1300_v46  ;;  %1869 = vmatpush3.bf16.msra.mxu1 %v1308_v39 }
  0xc2   : > { %v1386_v50 = vsel %vm1383_vm8, %v1384_v48, %v1385_v47  ;;  %vm1550_vm8 = vcmask 41984  }
  0xc4   : > { %1865 = vmatmul.mubr.msk.bf16.vlgmr.msra.gmra.mrb[12].mxu0 %vm685_vm2, %v1203_v10 }
  0xc5   : > { %1876 = vmatprep.mubr.msk.bf16.mxu0 %vm685_vm2, %v1386_v50  ;;  %1875 = vmatpush3.bf16.msra.mxu0 %v1394_v49 }
  0xc8   : > { %1871 = vmatmul.mubr.msk.bf16.vlgmr.msra.gmra.mrb[12].mxu1 %vm685_vm2, %v1299_v38 }
  0xcc   : > { %1877 = vmatmul.mubr.msk.bf16.vlgmr.msra.gmra.mrb[16].mxu0 %vm685_vm2, %v1385_v47  ;;  %v1456_v47 = vlaneseq }
  0xce   : > { %v1457_v48 = vshrl.u32 %v1456_v47, 7 }
 0x17f   : > { %v1830_v51 = vpop.f32.mrb[0].mxu0 }
 0x180   : > { %747 = vst.msk [vmem:[#allocation3 + $0x10] sm:$0x7] %vm746_vm9, %v1830_v51  ;;  %v730_v52 = vpop.f32.mrb[1].mxu0 }
 0x181   : > { %744 = vst.msk [vmem:[#allocation3] sm:$0xff] %vm685_vm2, %v730_v52  ;;  %v1831_v53 = vpop.f32.mrb[2].mxu0 }
 0x182   : > { %v733_v54 = vpop.f32.mrb[3].mxu0  ;;  %v1459_v53 = vadd.s32 16, %v1457_v48 }
 0x183   : > { %745 = vst.msk [vmem:[#allocation3 + $0x8] sm:$0xff] %vm685_vm2, %v733_v54  ;;  %v1836_v55 = vpop.f32.mrb[0].mxu1 }
 0x184   : > { %v804_v56 = vpop.f32.mrb[1].mxu1 }
 0x185   : > { %v1837_v57 = vpop.f32.mrb[2].mxu1 }
 0x186   : > { %v807_v60 = vpop.f32.mrb[3].mxu1 }
 0x187   : > { %v820_v61 = vld [vmem:[#allocation3 + $0x10] sm:$0x7]  ;;  %v1842_v62 = vpop.f32.mrb[4].mxu0 }
 0x188   : > { %v823_v63 = vadd.f32 %v1836_v55, %v820_v61  ;;  %v818_v42 = vld [vmem:[#allocation3] sm:$0xff]  ;;  %v899_v58 = vpop.f32.mrb[5].mxu0 }
 0x189   : > { %v821_v43 = vadd.f32 %v818_v42, %v804_v56  ;;  %v1843_v59 = vpop.f32.mrb[6].mxu0  ;;  %v1458_v56 = vadd.s32 8, %v1457_v48 }
 0x18a   : > { %826 = vst.msk [vmem:[#allocation3 + $0x10] sm:$0x7] %vm746_vm9, %v823_v63  ;;  %v819_v0 = vld [vmem:[#allocation3 + $0x8] sm:$0xff]  ;;  %v902_v2 = vpop.f32.mrb[7].mxu0 }
 0x18b   : > { %824 = vst.msk [vmem:[#allocation3] sm:$0xff] %vm685_vm2, %v821_v43  ;;  %v822_v3 = vadd.f32 %v819_v0, %v807_v60  ;;  %v1848_v4 = vpop.f32.mrb[4].mxu1  ;;  %v2293_v57 = vmul.u32.u64.low 3435973837, %v1459_v53  ;;  %v2294_v60 = vmul.u32.u64.high 3435973837, %v1459_v53, %v2293_v57 }
 0x18c   : > { %v978_v5 = vpop.f32.mrb[5].mxu1  ;;  %v2299_v63 = vmul.u32.u64.low 3435973837, %v1458_v56  ;;  %v2300_v42 = vmul.u32.u64.high 3435973837, %v1458_v56, %v2299_v63 }
 0x18d   : > { %825 = vst.msk [vmem:[#allocation3 + $0x8] sm:$0xff] %vm685_vm2, %v822_v3  ;;  %v1849_v6 = vpop.f32.mrb[6].mxu1 }
 0x18e   : > { %v981_v7 = vpop.f32.mrb[7].mxu1  ;;  %v1477_v6 = vshrl.u32 %v2300_v42, 2 }
 0x18f   : > { %v1854_v8 = vpop.f32.mrb[8].mxu0 }
 0x190   : > { %v1057_v9 = vpop.f32.mrb[9].mxu0 }
 0x191   : > { %v915_v10 = vld [vmem:[#allocation3 + $0x10] sm:$0x7]  ;;  %v1855_v11 = vpop.f32.mrb[10].mxu0 }
 0x192   : > { %v918_v12 = vadd.f32 %v1842_v62, %v915_v10  ;;  %v913_v27 = vld [vmem:[#allocation3] sm:$0xff]  ;;  %v1060_v35 = vpop.f32.mrb[11].mxu0  ;;  %v2296_v61 = vmul.u32.u64.low 3435973837, %v1457_v48  ;;  %v2297_v62 = vmul.u32.u64.high 3435973837, %v1457_v48, %v2296_v61 }
 0x193   : > { %v916_v13 = vadd.f32 %v913_v27, %v899_v58  ;;  %v1860_v15 = vpop.f32.mrb[8].mxu1 }
 0x194   : > { %921 = vst.msk [vmem:[#allocation3 + $0x10] sm:$0x7] %vm746_vm9, %v918_v12  ;;  %v914_v16 = vld [vmem:[#allocation3 + $0x8] sm:$0xff]  ;;  %v1151_v17 = vpop.f32.mrb[9].mxu1  ;;  %v1478_v12 = vmul.u32 5, %v1477_v6 }
 0x195   : > { %919 = vst.msk [vmem:[#allocation3] sm:$0xff] %vm685_vm2, %v916_v13  ;;  %v917_v18 = vadd.f32 %v914_v16, %v902_v2  ;;  %v1861_v19 = vpop.f32.mrb[10].mxu1 }
 0x196   : > { %v1154_v20 = vpop.f32.mrb[11].mxu1 }
 0x197   : > { %920 = vst.msk [vmem:[#allocation3 + $0x8] sm:$0xff] %vm685_vm2, %v917_v18  ;;  %v1866_v21 = vpop.f32.mrb[12].mxu0 }
 0x198   : > { %v1248_v1 = vpop.f32.mrb[13].mxu0 }
 0x199   : > { %v1867_v14 = vpop.f32.mrb[14].mxu0 }
 0x19a   : > { %v1251_v22 = vpop.f32.mrb[15].mxu0 }
 0x19b   : > { %v994_v23 = vld [vmem:[#allocation3 + $0x10] sm:$0x7]  ;;  %v1872_v24 = vpop.f32.mrb[12].mxu1 }
 0x19c   : > { %v997_v41 = vadd.f32 %v1848_v4, %v994_v23  ;;  %v992_v25 = vld [vmem:[#allocation3] sm:$0xff]  ;;  %v1344_v26 = vpop.f32.mrb[13].mxu1  ;;  %v1488_v4 = vshrl.u32 %v2294_v60, 2 }
 0x19d   : > { %v995_v28 = vadd.f32 %v992_v25, %v978_v5  ;;  %v1873_v29 = vpop.f32.mrb[14].mxu1  ;;  %v1466_v5 = vshrl.u32 %v2297_v62, 2 }
 0x19e   : > { %1000 = vst.msk [vmem:[#allocation3 + $0x10] sm:$0x7] %vm746_vm9, %v997_v41  ;;  %v993_v31 = vld [vmem:[#allocation3 + $0x8] sm:$0xff]  ;;  %v1347_v32 = vpop.f32.mrb[15].mxu1  ;;  %v1966_v29 = vmov 0.0  }
 0x19f   : > { %998 = vst.msk [vmem:[#allocation3] sm:$0xff] %vm685_vm2, %v995_v28  ;;  %v996_v30 = vadd.f32 %v993_v31, %v981_v7  ;;  %v2280_v33 = vpop.f32.mrb[16].mxu0  ;;  %v1489_v7 = vmul.u32 5, %v1488_v4 }
 0x1a0   : > { %v2282_v34 = vpop.f32.mrb[17].mxu0 }
 0x1a1   : > { %999 = vst.msk [vmem:[#allocation3 + $0x8] sm:$0xff] %vm685_vm2, %v996_v30  ;;  %v1879_v36 = vpop.f32.mrb[18].mxu0 }
 0x1a2   : > { %v2285_v37 = vpop.f32.mrb[19].mxu0 }
 0x1a5   : > { %v1073_v38 = vld [vmem:[#allocation3 + $0x10] sm:$0x7] }
 0x1a6   : > { %v1076_v39 = vadd.f32 %v1854_v8, %v1073_v38  ;;  %v1071_v40 = vld [vmem:[#allocation3] sm:$0xff]  ;;  %v1467_v8 = vmul.u32 5, %v1466_v5 }
 0x1a7   : > { %v1074_v44 = vadd.f32 %v1071_v40, %v1057_v9 }
 0x1a8   : > { %1079 = vst.msk [vmem:[#allocation3 + $0x10] sm:$0x7] %vm746_vm9, %v1076_v39  ;;  %v1072_v45 = vld [vmem:[#allocation3 + $0x8] sm:$0xff] }
 0x1a9   : > { %1077 = vst.msk [vmem:[#allocation3] sm:$0xff] %vm685_vm2, %v1074_v44  ;;  %v1075_v46 = vadd.f32 %v1072_v45, %v1060_v35  ;;  %v1490_v35 = vsub.s32 %v1459_v53, %v1489_v7 }
 0x1ab   : > { %1078 = vst.msk [vmem:[#allocation3 + $0x8] sm:$0xff] %vm685_vm2, %v1075_v46  ;;  %vm1495_vm10 = vcmp.ne.s32.totalorder %v1490_v35, 0  ;;  %vm1498_vm11 = vcmp.lt.s32.totalorder %v1490_v35, 0 }
 0x1ac   : > { %vm2311_vm14 = vmand %vm1498_vm11, %vm1495_vm10 }
 0x1af   : > { %v1167_v49 = vld [vmem:[#allocation3 + $0x10] sm:$0x7] }
 0x1b0   : > { %v1170_v50 = vadd.f32 %v1860_v15, %v1167_v49  ;;  %v1165_v51 = vld [vmem:[#allocation3] sm:$0xff]  ;;  %v1468_v15 = vsub.s32 %v1457_v48, %v1467_v8 }
 0x1b1   : > { %v1168_v52 = vadd.f32 %v1165_v51, %v1151_v17  ;;  %v1479_v17 = vsub.s32 %v1458_v56, %v1478_v12 }
 0x1b2   : > { %1173 = vst.msk [vmem:[#allocation3 + $0x10] sm:$0x7] %vm746_vm9, %v1170_v50  ;;  %v1166_v54 = vld [vmem:[#allocation3 + $0x8] sm:$0xff]  ;;  %vm1493_vm12 = vcmp.ne.s32.totalorder %v1468_v15, 0  ;;  %vm1496_vm13 = vcmp.lt.s32.totalorder %v1468_v15, 0  ;;  %v1502_v19 = vadd.s32 5, %v1468_v15 }
 0x1b3   : > { %1171 = vst.msk [vmem:[#allocation3] sm:$0xff] %vm685_vm2, %v1168_v52  ;;  %v1169_v55 = vadd.f32 %v1166_v54, %v1154_v20  ;;  %v1504_v20 = vadd.s32 5, %v1490_v35  ;;  %vm1494_vm15 = vcmp.ne.s32.totalorder %v1479_v17, 0  ;;  %vm1497_vm0 = vcmp.lt.s32.totalorder %v1479_v17, 0  ;;  %vm1499_vm1 = vmand %vm1496_vm13, %vm1493_vm12 }
 0x1b4   : > { %vm1500_vm3 = vmand %vm1497_vm0, %vm1494_vm15 }
 0x1b5   : > { %1172 = vst.msk [vmem:[#allocation3 + $0x8] sm:$0xff] %vm685_vm2, %v1169_v55  ;;  %v1507_v41 = vsel %vm2311_vm14, %v1504_v20, %v1490_v35 }
 0x1b6   : > { %vm1510_vm6 = vcmp.lt.s32.totalorder %v1507_v41, 4 }
 0x1b9   : > { %v1264_v58 = vld [vmem:[#allocation3 + $0x10] sm:$0x7] }
 0x1ba   : > { %v1267_v43 = vadd.f32 %v1866_v21, %v1264_v58  ;;  %v1262_v59 = vld [vmem:[#allocation3] sm:$0xff] }
 0x1bb   : > { %v1265_v0 = vadd.f32 %v1262_v59, %v1248_v1 }
 0x1bc   : > { %1270 = vst.msk [vmem:[#allocation3 + $0x10] sm:$0x7] %vm746_vm9, %v1267_v43  ;;  %v1263_v2 = vld [vmem:[#allocation3 + $0x8] sm:$0xff] }
 0x1bd   : > { %1268 = vst.msk [vmem:[#allocation3] sm:$0xff] %vm685_vm2, %v1265_v0  ;;  %v1266_v3 = vadd.f32 %v1263_v2, %v1251_v22  ;;  %v1503_v22 = vadd.s32 5, %v1479_v17 }
 0x1bf   : > { %1269 = vst.msk [vmem:[#allocation3 + $0x8] sm:$0xff] %vm685_vm2, %v1266_v3  ;;  %v1506_v28 = vsel %vm1500_vm3, %v1503_v22, %v1479_v17 }
 0x1c0   : > { %vm1509_vm7 = vcmp.lt.s32.totalorder %v1506_v28, 4 }
 0x1c1   : > { %v1755_v36 = vsel %vm1509_vm7, 1.0, %v1966_v29 }
 0x1c3   : > { %v1360_v9 = vld [vmem:[#allocation3 + $0x10] sm:$0x7] }
 0x1c4   : > { %v1363_v10 = vadd.f32 %v1872_v24, %v1360_v9  ;;  %v1358_v11 = vld [vmem:[#allocation3] sm:$0xff]  ;;  %v1505_v24 = vsel %vm1499_vm1, %v1502_v19, %v1468_v15 }
 0x1c5   : > { %v1361_v27 = vadd.f32 %v1358_v11, %v1344_v26  ;;  %vm1508_vm5 = vcmp.lt.s32.totalorder %v1505_v24, 4 }
 0x1c6   : > { %1366 = vst.msk [vmem:[#allocation3 + $0x10] sm:$0x7] %vm746_vm9, %v1363_v10  ;;  %v1359_v13 = vld [vmem:[#allocation3 + $0x8] sm:$0xff]  ;;  %v1754_v31 = vsel %vm1508_vm5, 1.0, %v1966_v29 }
 0x1c7   : > { %1364 = vst.msk [vmem:[#allocation3] sm:$0xff] %vm685_vm2, %v1361_v27  ;;  %v1362_v16 = vadd.f32 %v1359_v13, %v1347_v32  ;;  %v1756_v32 = vsel %vm1510_vm6, 1.0, %v1966_v29 }
 0x1c9   : > { %1365 = vst.msk [vmem:[#allocation3 + $0x8] sm:$0xff] %vm685_vm2, %v1362_v16 }
 0x1cd   : > { %v1446_v21 = vld [vmem:[#allocation3 + $0x10] sm:$0x7] }
 0x1ce   : > { %v1449_v1 = vadd.f32 %v2280_v33, %v1446_v21  ;;  %v1444_v14 = vld [vmem:[#allocation3] sm:$0xff] }
 0x1cf   : > { %v1447_v23 = vadd.f32 %v1444_v14, %v2282_v34 }
 0x1d0   : > { %1452 = vst.msk [vmem:[#allocation3 + $0x10] sm:$0x7] %vm746_vm9, %v1449_v1  ;;  %v1445_v25 = vld [vmem:[#allocation3 + $0x8] sm:$0xff] }
 0x1d1   : > { %1450 = vst.msk [vmem:[#allocation3] sm:$0xff] %vm685_vm2, %v1447_v23  ;;  %v1448_v26 = vadd.f32 %v1445_v25, %v2285_v37 }
 0x1d3   : > { %1451 = vst.msk [vmem:[#allocation3 + $0x8] sm:$0xff] %vm685_vm2, %v1448_v26 }
 0x1d7   : > { %v1455_v30 = vld [vmem:[#allocation3 + $0x10] sm:$0x7] }
 0x1d8   : > { %v1453_v33 = vld [vmem:[#allocation3] sm:$0xff]  ;;  %v1519_v38 = vmul.f32 %v1756_v32, %v1455_v30 }
 0x1d9   : > { %v1548_v34 = vld [vmem:[#allocation3] sm:$0xf]  ;;  %v1517_v37 = vmul.f32 %v1754_v31, %v1453_v33 }
 0x1da   : > { %v1549_v39 = vpack.c.bf16 %v1548_v34, %v1548_v34  ;;  %v1454_v40 = vld [vmem:[#allocation3 + $0x8] sm:$0xff]  ;;  %v1535_v53 = vmul.f32 %v1519_v38, %v1519_v38  ;;  %v1523_v60 = vsel %vm746_vm9, %v1519_v38, 0.0 }
 0x1db   : > { %v1552_v44 = vld [vmem:[#allocation3 + $0x5] sm:$0xf]  ;;  %v1556_v45 = vld [vmem:[#allocation3 + $0xa] sm:$0xf]  ;;  %v1533_v46 = vmul.f32 %v1517_v37, %v1517_v37  ;;  %v1518_v47 = vmul.f32 %v1755_v36, %v1454_v40  ;;  %v1560_v49 = vld [vmem:[#allocation3 + $0xf] sm:$0xf] }
 0x1dc   : > { %1551 = vst.msk [vmem:[%s360_s16] sm:$0x3] %vm1550_vm8, %v1549_v39  ;;  %v1553_v48 = vpack.c.bf16 %v1552_v44, %v1552_v44  ;;  %v1557_v50 = vpack.c.bf16 %v1556_v45, %v1556_v45  ;;  %v1561_v51 = vpack.c.bf16 %v1560_v49, %v1560_v49  ;;  %v1520_v52 = vsel %vm685_vm2, %v1517_v37, 0.0 }
 0x1dd   : > { %v1521_v54 = vsel %vm685_vm2, %v1518_v47, 0.0  ;;  %v1534_v55 = vmul.f32 %v1518_v47, %v1518_v47  ;;  %v1536_v57 = vsel %vm685_vm2, %v1533_v46, 0.0  ;;  %v1539_v42 = vsel %vm746_vm9, %v1535_v53, 0.0 }
 0x1de   : > { %1757 = vst.msk [vmem:[%s360_s16 + $0x2] sm:$0x3] %vm1550_vm8, %v1553_v48  ;;  %v1522_v56 = vadd.f32 %v1521_v54, %v1520_v52  ;;  %1758 = vst.msk [vmem:[%s360_s16 + $0x4] sm:$0x3] %vm1550_vm8, %v1557_v50 }
 0x1df   : > { %1759 = vst.msk [vmem:[%s360_s16 + $0x6] sm:$0x3] %vm1550_vm8, %v1561_v51  ;;  %v1537_v61 = vsel %vm685_vm2, %v1534_v55, 0.0 }
 0x1e0   : > { %v1524_v62 = vadd.f32 %v1523_v60, %v1522_v56  ;;  %v1538_v63 = vadd.f32 %v1537_v61, %v1536_v57 }
 0x1e2   : > { %v1525_v58 = vrot.slane %v1524_v62, 4  ;;  %v1540_v43 = vadd.f32 %v1539_v42, %v1538_v63 }
 0x1e4   : > { %v1526_v59 = vadd.f32 %v1525_v58, %v1524_v62  ;;  %v1541_v0 = vrot.slane %v1540_v43, 4 }
 0x1e6   : > { %v1527_v2 = vrot.slane %v1526_v59, 2  ;;  %v1542_v3 = vadd.f32 %v1541_v0, %v1540_v43 }
 0x1e8   : > { %v1528_v4 = vadd.f32 %v1527_v2, %v1526_v59  ;;  %v1543_v5 = vrot.slane %v1542_v3, 2 }
 0x1ea   : > { %v1529_v6 = vrot.slane %v1528_v4, 1  ;;  %v1544_v7 = vadd.f32 %v1543_v5, %v1542_v3 }
 0x1ec   : > { %v1530_v8 = vadd.f32 %v1529_v6, %v1528_v4  ;;  %v1545_v9 = vrot.slane %v1544_v7, 1 }
 0x1ee   : > { %1532 = vst.msk [vmem:[%s364_s19] sm:$0x1] %vm448_vm4, %v1530_v8  ;;  %v1546_v10 = vadd.f32 %v1545_v9, %v1544_v7 }
 0x1f0   : > { %1547 = vst.msk [vmem:[%s364_s19 + $0x1] sm:$0x1] %vm448_vm4, %v1546_v10 }
 0x1f1 PF: > { %p14_p9 = scmp.ge.s32.totalorder %s2019_s25, 4   ;;  %s2373_s21 = smov %s1959_s22 }
 0x1f2   : > { %s2374_s22 = smov %s2028_s28  ;;  %s2375_s23 = smov %s2019_s25 }
 0x1f3   :  { %16 = sbr.rel (!%p14_p9) target bundleno = 2 (0x2), region = 148 }

</bundles_post_ra>
